<compile_context>
chip_gen: v7x
topology: tpu7x:2x2x1
jax: 0.10.0
libtpu: 0.0.40
codegen_flags: <defaults>
</compile_context>

<pallas_src>
import functools
import math

import jax
import jax.numpy as jnp
from jax import lax
from jax.experimental import pallas as pl
from jax.experimental.pallas import tpu as pltpu


def clip_layer_kernel(x_ref, ln1g_ref, ln1b_ref, w_in_ref, b_in_ref,
                      w_out_ref, b_out_ref, ln2g_ref, ln2b_ref,
                      w1_ref, b1_ref, w2_ref, b2_ref, o_ref, acc_ref,
                      *, n_head):
    Bt, S, E = x_ref.shape
    d_head = E // n_head
    rows = Bt * S
    eps = 1e-5
    bf16 = jnp.bfloat16
    f32 = jnp.float32

    def layernorm(h, g, b):
        # single-pass variance: E[x^2] - mu^2
        mu = jnp.mean(h, axis=-1, keepdims=True)
        var = jnp.mean(h * h, axis=-1, keepdims=True) - mu * mu
        return (h - mu) * lax.rsqrt(var + eps) * g + b

    # Full (Bt*S, E) row slab so projection / FFN matmuls see a tall M dim.
    x = x_ref[...].astype(f32).reshape(rows, E)

    # ---- self-attention block -------------------------------------------
    h1 = layernorm(x, ln1g_ref[0], ln1b_ref[0])

    # in_proj: (rows, E) @ (E, 3E) + (3E,).  The 1/sqrt(d_head) scale has been
    # pre-folded into the Q columns of w_in / b_in on the host.
    qkv = jnp.dot(h1.astype(bf16), w_in_ref[...],
                  preferred_element_type=f32) + b_in_ref[0]
    q = qkv[:, 0:E]
    k = qkv[:, E:2 * E]
    v = qkv[:, 2 * E:3 * E]

    # Causal additive bias (0 / -inf), computed once per grid step.
    row_i = lax.broadcasted_iota(jnp.int32, (S, S), 0)
    col_i = lax.broadcasted_iota(jnp.int32, (S, S), 1)
    bias = jnp.where(col_i > row_i, -jnp.inf, 0.0).astype(f32)

    b_out = b_out_ref[0]
    dn = (((1,), (1,)), ((), ()))   # contract d_head of q and k (no transpose)

    for b in range(Bt):             # per-sequence causal attention
        r0 = b * S
        acc_b = x[r0:r0 + S, :] + b_out          # residual + out-proj bias
        for hd in range(n_head):
            c0 = hd * d_head
            qh = q[r0:r0 + S, c0:c0 + d_head].astype(bf16)
            kh = k[r0:r0 + S, c0:c0 + d_head].astype(bf16)
            vh = v[r0:r0 + S, c0:c0 + d_head].astype(bf16)

            s = lax.dot_general(qh, kh, dn, preferred_element_type=f32)
            s = s + bias
            s = s - jnp.max(s, axis=-1, keepdims=True)
            p = jnp.exp(s)
            p = p * pl.reciprocal(jnp.sum(p, axis=-1, keepdims=True),
                                  approx=True)

            ho = jnp.dot(p.astype(bf16), vh, preferred_element_type=f32)
            # Fold the out-projection into the per-head accumulation: no
            # concatenate of head outputs, no extra (S, E) live values.
            acc_b = acc_b + jnp.dot(ho.astype(bf16),
                                    w_out_ref[c0:c0 + d_head, :],
                                    preferred_element_type=f32)
        acc_ref[r0:r0 + S, :] = acc_b

    x1 = acc_ref[...]                               # attention out + residual

    # ---- feed-forward block ----------------------------------------------
    h2 = layernorm(x1, ln2g_ref[0], ln2b_ref[0])
    m = jnp.dot(h2.astype(bf16), w1_ref[...],
                preferred_element_type=f32) + b1_ref[0]
    m = m * jax.nn.sigmoid(1.702 * m)               # QuickGELU (f32)
    out = jnp.dot(m.astype(bf16), w2_ref[...],
                  preferred_element_type=f32) + b2_ref[0] + x1

    o_ref[...] = out.reshape(Bt, S, E).astype(o_ref.dtype)


def clip_layer(x, params, n_head, block_b=None):
    B, S, E = x.shape
    (ln1g, ln1b, w_in, b_in, w_out, b_out,
     ln2g, ln2b, w1, b1, w2, b2) = params
    d_head = E // n_head
    scale = 1.0 / math.sqrt(d_head)

    # Host-side prep: fold the attention scale into the Q columns of the input
    # projection, and cast matmul weights to bf16 (biases / LN params stay f32).
    w_in_s = w_in.at[:, :E].multiply(scale)
    b_in_s = b_in.at[:, :E].multiply(scale)
    w_in_b = w_in_s.astype(jnp.bfloat16)
    w_out_b = w_out.astype(jnp.bfloat16)
    w1_b = w1.astype(jnp.bfloat16)
    w2_b = w2.astype(jnp.bfloat16)

    # Batch several sequences per grid step so the projection/FFN matmuls have
    # a tall M dimension (better MXU row utilization), while VMEM stays small.
    if block_b is None:
        block_b = 1
        for d in range(1, B + 1):
            if B % d == 0 and d * S <= 512:
                block_b = d
    assert B % block_b == 0, "block_b must divide the batch"
    rows = block_b * S

    kernel_params = (ln1g, ln1b, w_in_b, b_in_s, w_out_b, b_out,
                     ln2g, ln2b, w1_b, b1, w2_b, b2)

    def param_spec(p):
        return pl.BlockSpec(p.shape, lambda i: (0,) * p.ndim)

    in_specs = [pl.BlockSpec((block_b, S, E), lambda i: (i, 0, 0))]
    in_specs += [param_spec(p) for p in kernel_params]

    # Explicit scoped-VMEM budget: double-buffered weights + activation slabs
    # + intermediates, clamped to something safe on every generation.
    param_bytes = sum(int(p.size) * p.dtype.itemsize for p in kernel_params)
    act_bytes = rows * E * 4
    inter_bytes = rows * (3 * E + 4 * E) * 4 + 8 * S * S * 4
    est = 2 * param_bytes + 6 * act_bytes + inter_bytes
    vmem_limit = int(min(64 * 2 ** 20, max(32 * 2 ** 20, 2 * est)))

    return pl.pallas_call(
        functools.partial(clip_layer_kernel, n_head=n_head),
        out_shape=jax.ShapeDtypeStruct((B, S, E), x.dtype),
        grid_spec=pltpu.PrefetchScalarGridSpec(
            num_scalar_prefetch=0,
            grid=(B // block_b,),
            in_specs=in_specs,
            out_specs=pl.BlockSpec((block_b, S, E), lambda i: (i, 0, 0)),
            scratch_shapes=[pltpu.VMEM((rows, E), jnp.float32)],
        ),
        compiler_params=pltpu.CompilerParams(
            dimension_semantics=("parallel",),
            vmem_limit_bytes=vmem_limit),
    )(x, *kernel_params)


def clip_layer_ref(x, params, n_head):
    """Pure-JAX f32 reference mirroring the PyTorch forward pass."""
    (ln1g, ln1b, w_in, b_in, w_out, b_out,
     ln2g, ln2b, w1, b1, w2, b2) = params
    B, S, E = x.shape
    d_head = E // n_head
    eps = 1e-5

    def layernorm(h, g, b):
        mu = jnp.mean(h, axis=-1, keepdims=True)
        var = jnp.mean((h - mu) ** 2, axis=-1, keepdims=True)
        return (h - mu) / jnp.sqrt(var + eps) * g + b

    residue = x
    h = layernorm(x, ln1g[0], ln1b[0])
    qkv = h @ w_in + b_in[0]
    q, k, v = jnp.split(qkv, 3, axis=-1)
    q = q.reshape(B, S, n_head, d_head).transpose(0, 2, 1, 3)
    k = k.reshape(B, S, n_head, d_head).transpose(0, 2, 1, 3)
    v = v.reshape(B, S, n_head, d_head).transpose(0, 2, 1, 3)
    w = jnp.einsum("bhqd,bhkd->bhqk", q, k)
    mask = jnp.triu(jnp.ones((S, S), bool), 1)
    w = jnp.where(mask, -jnp.inf, w) / math.sqrt(d_head)
    w = jax.nn.softmax(w, axis=-1)
    o = jnp.einsum("bhqk,bhkd->bhqd", w, v).transpose(0, 2, 1, 3).reshape(B, S, E)
    o = o @ w_out + b_out[0]
    x1 = o + residue

    residue2 = x1
    h2 = layernorm(x1, ln2g[0], ln2b[0])
    h2 = h2 @ w1 + b1[0]
    h2 = h2 * jax.nn.sigmoid(1.702 * h2)
    h2 = h2 @ w2 + b2[0]
    return h2 + residue2


if __name__ == "__main__":
    B, S, E, n_head = 2, 8, 32, 4

    key = jax.random.PRNGKey(0)
    keys = jax.random.split(key, 16)

    x = jax.random.normal(keys[0], (B, S, E), jnp.float32)

    # Deterministic synthetic parameters (PyTorch Linear weight (out,in) is
    # stored here pre-transposed as (in,out)).
    ln1g = 1.0 + 0.05 * jax.random.normal(keys[1], (1, E), jnp.float32)
    ln1b = 0.05 * jax.random.normal(keys[2], (1, E), jnp.float32)
    w_in = 0.05 * jax.random.normal(keys[3], (E, 3 * E), jnp.float32)
    b_in = 0.05 * jax.random.normal(keys[4], (1, 3 * E), jnp.float32)
    w_out = 0.05 * jax.random.normal(keys[5], (E, E), jnp.float32)
    b_out = 0.05 * jax.random.normal(keys[6], (1, E), jnp.float32)
    ln2g = 1.0 + 0.05 * jax.random.normal(keys[7], (1, E), jnp.float32)
    ln2b = 0.05 * jax.random.normal(keys[8], (1, E), jnp.float32)
    w1 = 0.05 * jax.random.normal(keys[9], (E, 4 * E), jnp.float32)
    b1 = 0.05 * jax.random.normal(keys[10], (1, 4 * E), jnp.float32)
    w2 = 0.05 * jax.random.normal(keys[11], (4 * E, E), jnp.float32)
    b2 = 0.05 * jax.random.normal(keys[12], (1, E), jnp.float32)

    params = (ln1g, ln1b, w_in, b_in, w_out, b_out,
              ln2g, ln2b, w1, b1, w2, b2)

    out = clip_layer(x, params, n_head)
    out = jax.block_until_ready(out)

    ref = clip_layer_ref(x, params, n_head)
    assert out.shape == (B, S, E)
    # bf16 matmul inputs + approx reciprocal vs f32 reference -> relaxed tol.
    assert jnp.allclose(out, ref, atol=2e-2, rtol=2e-2), "mismatch vs reference"

    print("KERNEL_OK")
</pallas_src>

<mosaic_0001>
module attributes {stable_mosaic.version = 11 : i64} {
  func.func @clip_layer_kernel(%arg0: i32, %arg1: memref<2x8x32xf32, #tpu.memory_space<vmem>>, %arg2: memref<1x32xf32, #tpu.memory_space<vmem>>, %arg3: memref<1x32xf32, #tpu.memory_space<vmem>>, %arg4: memref<32x96xbf16, #tpu.memory_space<vmem>>, %arg5: memref<1x96xf32, #tpu.memory_space<vmem>>, %arg6: memref<32x32xbf16, #tpu.memory_space<vmem>>, %arg7: memref<1x32xf32, #tpu.memory_space<vmem>>, %arg8: memref<1x32xf32, #tpu.memory_space<vmem>>, %arg9: memref<1x32xf32, #tpu.memory_space<vmem>>, %arg10: memref<32x128xbf16, #tpu.memory_space<vmem>>, %arg11: memref<1x128xf32, #tpu.memory_space<vmem>>, %arg12: memref<128x32xbf16, #tpu.memory_space<vmem>>, %arg13: memref<1x32xf32, #tpu.memory_space<vmem>>, %arg14: memref<2x8x32xf32, #tpu.memory_space<vmem>>, %arg15: memref<16x32xf32, #tpu.memory_space<vmem>>) attributes {dimension_semantics = [#tpu.dimension_semantics<parallel>], iteration_bounds = array<i64: 1>, scalar_prefetch = 0 : i64, scratch_operands = 1 : i64, tpu.core_type = #tpu.core_type<tc>, window_params = [{transform_indices = @transform_0, window_bounds = array<i64: 2, 8, 32>}, {pipeline_mode = #tpu.pipeline_mode<synchronous>, transform_indices = @transform_1, window_bounds = array<i64: 1, 32>}, {pipeline_mode = #tpu.pipeline_mode<synchronous>, transform_indices = @transform_2, window_bounds = array<i64: 1, 32>}, {pipeline_mode = #tpu.pipeline_mode<synchronous>, transform_indices = @transform_3, window_bounds = array<i64: 32, 96>}, {pipeline_mode = #tpu.pipeline_mode<synchronous>, transform_indices = @transform_4, window_bounds = array<i64: 1, 96>}, {pipeline_mode = #tpu.pipeline_mode<synchronous>, transform_indices = @transform_5, window_bounds = array<i64: 32, 32>}, {pipeline_mode = #tpu.pipeline_mode<synchronous>, transform_indices = @transform_6, window_bounds = array<i64: 1, 32>}, {pipeline_mode = #tpu.pipeline_mode<synchronous>, transform_indices = @transform_7, window_bounds = array<i64: 1, 32>}, {pipeline_mode = #tpu.pipeline_mode<synchronous>, transform_indices = @transform_8, window_bounds = array<i64: 1, 32>}, {pipeline_mode = #tpu.pipeline_mode<synchronous>, transform_indices = @transform_9, window_bounds = array<i64: 32, 128>}, {pipeline_mode = #tpu.pipeline_mode<synchronous>, transform_indices = @transform_10, window_bounds = array<i64: 1, 128>}, {pipeline_mode = #tpu.pipeline_mode<synchronous>, transform_indices = @transform_11, window_bounds = array<i64: 128, 32>}, {pipeline_mode = #tpu.pipeline_mode<synchronous>, transform_indices = @transform_12, window_bounds = array<i64: 1, 32>}, {transform_indices = @transform_13, window_bounds = array<i64: 2, 8, 32>}]} {
    %c0 = arith.constant 0 : index
    %c0_0 = arith.constant 0 : index
    %c0_1 = arith.constant 0 : index
    %0 = vector.load %arg1[%c0, %c0_0, %c0_1] : memref<2x8x32xf32, #tpu.memory_space<vmem>>, vector<2x8x32xf32>
    %1 = vector.shape_cast %0 : vector<2x8x32xf32> to vector<16x32xf32>
    %c0_2 = arith.constant 0 : index
    %c0_3 = arith.constant 0 : index
    %2 = vector.load %arg2[%c0_2, %c0_3] : memref<1x32xf32, #tpu.memory_space<vmem>>, vector<1x32xf32>
    %3 = vector.shape_cast %2 : vector<1x32xf32> to vector<32xf32>
    %c0_4 = arith.constant 0 : index
    %c0_5 = arith.constant 0 : index
    %4 = vector.load %arg3[%c0_4, %c0_5] : memref<1x32xf32, #tpu.memory_space<vmem>>, vector<1x32xf32>
    %5 = vector.shape_cast %4 : vector<1x32xf32> to vector<32xf32>
    %cst = arith.constant dense<0.000000e+00> : vector<16xf32>
    %6 = vector.multi_reduction <add>, %1, %cst [1] : vector<16x32xf32> to vector<16xf32>
    %7 = vector.shape_cast %6 : vector<16xf32> to vector<16x1xf32>
    %cst_6 = arith.constant 3.200000e+01 : f32
    %8 = vector.broadcast %cst_6 : f32 to vector<16x1xf32>
    %9 = arith.divf %7, %8 : vector<16x1xf32>
    %10 = arith.mulf %1, %1 : vector<16x32xf32>
    %cst_7 = arith.constant dense<0.000000e+00> : vector<16xf32>
    %11 = vector.multi_reduction <add>, %10, %cst_7 [1] : vector<16x32xf32> to vector<16xf32>
    %12 = vector.shape_cast %11 : vector<16xf32> to vector<16x1xf32>
    %cst_8 = arith.constant 3.200000e+01 : f32
    %13 = vector.broadcast %cst_8 : f32 to vector<16x1xf32>
    %14 = arith.divf %12, %13 : vector<16x1xf32>
    %15 = arith.mulf %9, %9 : vector<16x1xf32>
    %16 = arith.subf %14, %15 : vector<16x1xf32>
    %17 = vector.broadcast %9 : vector<16x1xf32> to vector<16x32xf32>
    %18 = arith.subf %1, %17 : vector<16x32xf32>
    %cst_9 = arith.constant 9.99999974E-6 : f32
    %19 = vector.broadcast %cst_9 : f32 to vector<16x1xf32>
    %20 = arith.addf %16, %19 : vector<16x1xf32>
    %21 = math.rsqrt %20 : vector<16x1xf32>
    %22 = vector.broadcast %21 : vector<16x1xf32> to vector<16x32xf32>
    %23 = arith.mulf %18, %22 : vector<16x32xf32>
    %24 = vector.shape_cast %3 : vector<32xf32> to vector<1x32xf32>
    %25 = vector.broadcast %24 : vector<1x32xf32> to vector<16x32xf32>
    %26 = arith.mulf %23, %25 : vector<16x32xf32>
    %27 = vector.shape_cast %5 : vector<32xf32> to vector<1x32xf32>
    %28 = vector.broadcast %27 : vector<1x32xf32> to vector<16x32xf32>
    %29 = arith.addf %26, %28 : vector<16x32xf32>
    %30 = arith.truncf %29 : vector<16x32xf32> to vector<16x32xbf16>
    %c0_10 = arith.constant 0 : index
    %c0_11 = arith.constant 0 : index
    %31 = vector.load %arg4[%c0_10, %c0_11] : memref<32x96xbf16, #tpu.memory_space<vmem>>, vector<32x96xbf16>
    %cst_12 = arith.constant dense<0.000000e+00> : vector<16x96xf32>
    %32 = tpu.matmul %30, %31, %cst_12 {dimension_numbers = #tpu.dot_dimension_numbers<[1], [0], [0], [1], [0, 0, 1, 1], [], []>} : vector<16x32xbf16>, vector<32x96xbf16>, vector<16x96xf32> -> vector<16x96xf32>
    %c0_13 = arith.constant 0 : index
    %c0_14 = arith.constant 0 : index
    %33 = vector.load %arg5[%c0_13, %c0_14] : memref<1x96xf32, #tpu.memory_space<vmem>>, vector<1x96xf32>
    %34 = vector.shape_cast %33 : vector<1x96xf32> to vector<96xf32>
    %35 = vector.shape_cast %34 : vector<96xf32> to vector<1x96xf32>
    %36 = vector.broadcast %35 : vector<1x96xf32> to vector<16x96xf32>
    %37 = arith.addf %32, %36 : vector<16x96xf32>
    %38 = vector.extract_strided_slice %37 {offsets = [0, 0], sizes = [16, 32], strides = [1, 1]} : vector<16x96xf32> to vector<16x32xf32>
    %39 = vector.extract_strided_slice %37 {offsets = [0, 32], sizes = [16, 32], strides = [1, 1]} : vector<16x96xf32> to vector<16x32xf32>
    %40 = vector.extract_strided_slice %37 {offsets = [0, 64], sizes = [16, 32], strides = [1, 1]} : vector<16x96xf32> to vector<16x32xf32>
    %41 = tpu.iota {dimensions = array<i32: 0>} : vector<8x8xi32>
    %42 = tpu.iota {dimensions = array<i32: 1>} : vector<8x8xi32>
    %43 = arith.cmpi sgt, %42, %41 : vector<8x8xi32>
    %cst_15 = arith.constant 0xFF800000 : f32
    %cst_16 = arith.constant 0.000000e+00 : f32
    %44 = vector.broadcast %cst_15 : f32 to vector<8x8xf32>
    %45 = vector.broadcast %cst_16 : f32 to vector<8x8xf32>
    %46 = arith.select %43, %44, %45 : vector<8x8xi1>, vector<8x8xf32>
    %c0_17 = arith.constant 0 : index
    %c0_18 = arith.constant 0 : index
    %47 = vector.load %arg7[%c0_17, %c0_18] : memref<1x32xf32, #tpu.memory_space<vmem>>, vector<1x32xf32>
    %48 = vector.shape_cast %47 : vector<1x32xf32> to vector<32xf32>
    %49 = vector.extract_strided_slice %1 {offsets = [0, 0], sizes = [8, 32], strides = [1, 1]} : vector<16x32xf32> to vector<8x32xf32>
    %50 = vector.shape_cast %48 : vector<32xf32> to vector<1x32xf32>
    %51 = vector.broadcast %50 : vector<1x32xf32> to vector<8x32xf32>
    %52 = arith.addf %49, %51 : vector<8x32xf32>
    %53 = vector.extract_strided_slice %38 {offsets = [0, 0], sizes = [8, 8], strides = [1, 1]} : vector<16x32xf32> to vector<8x8xf32>
    %54 = arith.truncf %53 : vector<8x8xf32> to vector<8x8xbf16>
    %55 = vector.extract_strided_slice %39 {offsets = [0, 0], sizes = [8, 8], strides = [1, 1]} : vector<16x32xf32> to vector<8x8xf32>
    %56 = arith.truncf %55 : vector<8x8xf32> to vector<8x8xbf16>
    %57 = vector.extract_strided_slice %40 {offsets = [0, 0], sizes = [8, 8], strides = [1, 1]} : vector<16x32xf32> to vector<8x8xf32>
    %58 = arith.truncf %57 : vector<8x8xf32> to vector<8x8xbf16>
    %cst_19 = arith.constant dense<0.000000e+00> : vector<8x8xf32>
    %59 = tpu.matmul %54, %56, %cst_19 {dimension_numbers = #tpu.dot_dimension_numbers<[1], [1], [0], [0], [0, 0, 1, 0], [], []>} : vector<8x8xbf16>, vector<8x8xbf16>, vector<8x8xf32> -> vector<8x8xf32>
    %60 = arith.addf %59, %46 : vector<8x8xf32>
    %cst_20 = arith.constant dense<0xFF800000> : vector<8xf32>
    %61 = vector.multi_reduction <maximumf>, %60, %cst_20 [1] : vector<8x8xf32> to vector<8xf32>
    %62 = vector.shape_cast %61 : vector<8xf32> to vector<8x1xf32>
    %63 = vector.broadcast %62 : vector<8x1xf32> to vector<8x8xf32>
    %64 = arith.subf %60, %63 : vector<8x8xf32>
    %65 = math.exp %64 : vector<8x8xf32>
    %cst_21 = arith.constant dense<0.000000e+00> : vector<8xf32>
    %66 = vector.multi_reduction <add>, %65, %cst_21 [1] : vector<8x8xf32> to vector<8xf32>
    %67 = vector.shape_cast %66 : vector<8xf32> to vector<8x1xf32>
    %68 = tpu.reciprocal %67 {approx = true} : vector<8x1xf32> -> vector<8x1xf32>
    %69 = vector.broadcast %68 : vector<8x1xf32> to vector<8x8xf32>
    %70 = arith.mulf %65, %69 : vector<8x8xf32>
    %71 = arith.truncf %70 : vector<8x8xf32> to vector<8x8xbf16>
    %cst_22 = arith.constant dense<0.000000e+00> : vector<8x8xf32>
    %72 = tpu.matmul %71, %58, %cst_22 {dimension_numbers = #tpu.dot_dimension_numbers<[1], [0], [0], [1], [0, 0, 1, 1], [], []>} : vector<8x8xbf16>, vector<8x8xbf16>, vector<8x8xf32> -> vector<8x8xf32>
    %73 = arith.truncf %72 : vector<8x8xf32> to vector<8x8xbf16>
    %c0_23 = arith.constant 0 : index
    %c0_24 = arith.constant 0 : index
    %74 = vector.load %arg6[%c0_23, %c0_24] : memref<32x32xbf16, #tpu.memory_space<vmem>>, vector<8x32xbf16>
    %cst_25 = arith.constant dense<0.000000e+00> : vector<8x32xf32>
    %75 = tpu.matmul %73, %74, %cst_25 {dimension_numbers = #tpu.dot_dimension_numbers<[1], [0], [0], [1], [0, 0, 1, 1], [], []>} : vector<8x8xbf16>, vector<8x32xbf16>, vector<8x32xf32> -> vector<8x32xf32>
    %76 = arith.addf %52, %75 : vector<8x32xf32>
    %77 = vector.extract_strided_slice %38 {offsets = [0, 8], sizes = [8, 8], strides = [1, 1]} : vector<16x32xf32> to vector<8x8xf32>
    %78 = arith.truncf %77 : vector<8x8xf32> to vector<8x8xbf16>
    %79 = vector.extract_strided_slice %39 {offsets = [0, 8], sizes = [8, 8], strides = [1, 1]} : vector<16x32xf32> to vector<8x8xf32>
    %80 = arith.truncf %79 : vector<8x8xf32> to vector<8x8xbf16>
    %81 = vector.extract_strided_slice %40 {offsets = [0, 8], sizes = [8, 8], strides = [1, 1]} : vector<16x32xf32> to vector<8x8xf32>
    %82 = arith.truncf %81 : vector<8x8xf32> to vector<8x8xbf16>
    %cst_26 = arith.constant dense<0.000000e+00> : vector<8x8xf32>
    %83 = tpu.matmul %78, %80, %cst_26 {dimension_numbers = #tpu.dot_dimension_numbers<[1], [1], [0], [0], [0, 0, 1, 0], [], []>} : vector<8x8xbf16>, vector<8x8xbf16>, vector<8x8xf32> -> vector<8x8xf32>
    %84 = arith.addf %83, %46 : vector<8x8xf32>
    %cst_27 = arith.constant dense<0xFF800000> : vector<8xf32>
    %85 = vector.multi_reduction <maximumf>, %84, %cst_27 [1] : vector<8x8xf32> to vector<8xf32>
    %86 = vector.shape_cast %85 : vector<8xf32> to vector<8x1xf32>
    %87 = vector.broadcast %86 : vector<8x1xf32> to vector<8x8xf32>
    %88 = arith.subf %84, %87 : vector<8x8xf32>
    %89 = math.exp %88 : vector<8x8xf32>
    %cst_28 = arith.constant dense<0.000000e+00> : vector<8xf32>
    %90 = vector.multi_reduction <add>, %89, %cst_28 [1] : vector<8x8xf32> to vector<8xf32>
    %91 = vector.shape_cast %90 : vector<8xf32> to vector<8x1xf32>
    %92 = tpu.reciprocal %91 {approx = true} : vector<8x1xf32> -> vector<8x1xf32>
    %93 = vector.broadcast %92 : vector<8x1xf32> to vector<8x8xf32>
    %94 = arith.mulf %89, %93 : vector<8x8xf32>
    %95 = arith.truncf %94 : vector<8x8xf32> to vector<8x8xbf16>
    %cst_29 = arith.constant dense<0.000000e+00> : vector<8x8xf32>
    %96 = tpu.matmul %95, %82, %cst_29 {dimension_numbers = #tpu.dot_dimension_numbers<[1], [0], [0], [1], [0, 0, 1, 1], [], []>} : vector<8x8xbf16>, vector<8x8xbf16>, vector<8x8xf32> -> vector<8x8xf32>
    %97 = arith.truncf %96 : vector<8x8xf32> to vector<8x8xbf16>
    %c8 = arith.constant 8 : index
    %c0_30 = arith.constant 0 : index
    %98 = vector.load %arg6[%c8, %c0_30] : memref<32x32xbf16, #tpu.memory_space<vmem>>, vector<8x32xbf16>
    %cst_31 = arith.constant dense<0.000000e+00> : vector<8x32xf32>
    %99 = tpu.matmul %97, %98, %cst_31 {dimension_numbers = #tpu.dot_dimension_numbers<[1], [0], [0], [1], [0, 0, 1, 1], [], []>} : vector<8x8xbf16>, vector<8x32xbf16>, vector<8x32xf32> -> vector<8x32xf32>
    %100 = arith.addf %76, %99 : vector<8x32xf32>
    %101 = vector.extract_strided_slice %38 {offsets = [0, 16], sizes = [8, 8], strides = [1, 1]} : vector<16x32xf32> to vector<8x8xf32>
    %102 = arith.truncf %101 : vector<8x8xf32> to vector<8x8xbf16>
    %103 = vector.extract_strided_slice %39 {offsets = [0, 16], sizes = [8, 8], strides = [1, 1]} : vector<16x32xf32> to vector<8x8xf32>
    %104 = arith.truncf %103 : vector<8x8xf32> to vector<8x8xbf16>
    %105 = vector.extract_strided_slice %40 {offsets = [0, 16], sizes = [8, 8], strides = [1, 1]} : vector<16x32xf32> to vector<8x8xf32>
    %106 = arith.truncf %105 : vector<8x8xf32> to vector<8x8xbf16>
    %cst_32 = arith.constant dense<0.000000e+00> : vector<8x8xf32>
    %107 = tpu.matmul %102, %104, %cst_32 {dimension_numbers = #tpu.dot_dimension_numbers<[1], [1], [0], [0], [0, 0, 1, 0], [], []>} : vector<8x8xbf16>, vector<8x8xbf16>, vector<8x8xf32> -> vector<8x8xf32>
    %108 = arith.addf %107, %46 : vector<8x8xf32>
    %cst_33 = arith.constant dense<0xFF800000> : vector<8xf32>
    %109 = vector.multi_reduction <maximumf>, %108, %cst_33 [1] : vector<8x8xf32> to vector<8xf32>
    %110 = vector.shape_cast %109 : vector<8xf32> to vector<8x1xf32>
    %111 = vector.broadcast %110 : vector<8x1xf32> to vector<8x8xf32>
    %112 = arith.subf %108, %111 : vector<8x8xf32>
    %113 = math.exp %112 : vector<8x8xf32>
    %cst_34 = arith.constant dense<0.000000e+00> : vector<8xf32>
    %114 = vector.multi_reduction <add>, %113, %cst_34 [1] : vector<8x8xf32> to vector<8xf32>
    %115 = vector.shape_cast %114 : vector<8xf32> to vector<8x1xf32>
    %116 = tpu.reciprocal %115 {approx = true} : vector<8x1xf32> -> vector<8x1xf32>
    %117 = vector.broadcast %116 : vector<8x1xf32> to vector<8x8xf32>
    %118 = arith.mulf %113, %117 : vector<8x8xf32>
    %119 = arith.truncf %118 : vector<8x8xf32> to vector<8x8xbf16>
    %cst_35 = arith.constant dense<0.000000e+00> : vector<8x8xf32>
    %120 = tpu.matmul %119, %106, %cst_35 {dimension_numbers = #tpu.dot_dimension_numbers<[1], [0], [0], [1], [0, 0, 1, 1], [], []>} : vector<8x8xbf16>, vector<8x8xbf16>, vector<8x8xf32> -> vector<8x8xf32>
    %121 = arith.truncf %120 : vector<8x8xf32> to vector<8x8xbf16>
    %c16 = arith.constant 16 : index
    %c0_36 = arith.constant 0 : index
    %122 = vector.load %arg6[%c16, %c0_36] : memref<32x32xbf16, #tpu.memory_space<vmem>>, vector<8x32xbf16>
    %cst_37 = arith.constant dense<0.000000e+00> : vector<8x32xf32>
    %123 = tpu.matmul %121, %122, %cst_37 {dimension_numbers = #tpu.dot_dimension_numbers<[1], [0], [0], [1], [0, 0, 1, 1], [], []>} : vector<8x8xbf16>, vector<8x32xbf16>, vector<8x32xf32> -> vector<8x32xf32>
    %124 = arith.addf %100, %123 : vector<8x32xf32>
    %125 = vector.extract_strided_slice %38 {offsets = [0, 24], sizes = [8, 8], strides = [1, 1]} : vector<16x32xf32> to vector<8x8xf32>
    %126 = arith.truncf %125 : vector<8x8xf32> to vector<8x8xbf16>
    %127 = vector.extract_strided_slice %39 {offsets = [0, 24], sizes = [8, 8], strides = [1, 1]} : vector<16x32xf32> to vector<8x8xf32>
    %128 = arith.truncf %127 : vector<8x8xf32> to vector<8x8xbf16>
    %129 = vector.extract_strided_slice %40 {offsets = [0, 24], sizes = [8, 8], strides = [1, 1]} : vector<16x32xf32> to vector<8x8xf32>
    %130 = arith.truncf %129 : vector<8x8xf32> to vector<8x8xbf16>
    %cst_38 = arith.constant dense<0.000000e+00> : vector<8x8xf32>
    %131 = tpu.matmul %126, %128, %cst_38 {dimension_numbers = #tpu.dot_dimension_numbers<[1], [1], [0], [0], [0, 0, 1, 0], [], []>} : vector<8x8xbf16>, vector<8x8xbf16>, vector<8x8xf32> -> vector<8x8xf32>
    %132 = arith.addf %131, %46 : vector<8x8xf32>
    %cst_39 = arith.constant dense<0xFF800000> : vector<8xf32>
    %133 = vector.multi_reduction <maximumf>, %132, %cst_39 [1] : vector<8x8xf32> to vector<8xf32>
    %134 = vector.shape_cast %133 : vector<8xf32> to vector<8x1xf32>
    %135 = vector.broadcast %134 : vector<8x1xf32> to vector<8x8xf32>
    %136 = arith.subf %132, %135 : vector<8x8xf32>
    %137 = math.exp %136 : vector<8x8xf32>
    %cst_40 = arith.constant dense<0.000000e+00> : vector<8xf32>
    %138 = vector.multi_reduction <add>, %137, %cst_40 [1] : vector<8x8xf32> to vector<8xf32>
    %139 = vector.shape_cast %138 : vector<8xf32> to vector<8x1xf32>
    %140 = tpu.reciprocal %139 {approx = true} : vector<8x1xf32> -> vector<8x1xf32>
    %141 = vector.broadcast %140 : vector<8x1xf32> to vector<8x8xf32>
    %142 = arith.mulf %137, %141 : vector<8x8xf32>
    %143 = arith.truncf %142 : vector<8x8xf32> to vector<8x8xbf16>
    %cst_41 = arith.constant dense<0.000000e+00> : vector<8x8xf32>
    %144 = tpu.matmul %143, %130, %cst_41 {dimension_numbers = #tpu.dot_dimension_numbers<[1], [0], [0], [1], [0, 0, 1, 1], [], []>} : vector<8x8xbf16>, vector<8x8xbf16>, vector<8x8xf32> -> vector<8x8xf32>
    %145 = arith.truncf %144 : vector<8x8xf32> to vector<8x8xbf16>
    %c24 = arith.constant 24 : index
    %c0_42 = arith.constant 0 : index
    %146 = vector.load %arg6[%c24, %c0_42] : memref<32x32xbf16, #tpu.memory_space<vmem>>, vector<8x32xbf16>
    %cst_43 = arith.constant dense<0.000000e+00> : vector<8x32xf32>
    %147 = tpu.matmul %145, %146, %cst_43 {dimension_numbers = #tpu.dot_dimension_numbers<[1], [0], [0], [1], [0, 0, 1, 1], [], []>} : vector<8x8xbf16>, vector<8x32xbf16>, vector<8x32xf32> -> vector<8x32xf32>
    %148 = arith.addf %124, %147 : vector<8x32xf32>
    %c0_44 = arith.constant 0 : index
    %c0_45 = arith.constant 0 : index
    %149 = vector.load %arg15[%c0_44, %c0_45] : memref<16x32xf32, #tpu.memory_space<vmem>>, vector<8x32xf32>
    tpu.vector_store %arg15[%c0_44, %c0_45], %148 {strides = array<i32>} : memref<16x32xf32, #tpu.memory_space<vmem>>, vector<8x32xf32>,
    %150 = vector.extract_strided_slice %1 {offsets = [8, 0], sizes = [8, 32], strides = [1, 1]} : vector<16x32xf32> to vector<8x32xf32>
    %151 = vector.shape_cast %48 : vector<32xf32> to vector<1x32xf32>
    %152 = vector.broadcast %151 : vector<1x32xf32> to vector<8x32xf32>
    %153 = arith.addf %150, %152 : vector<8x32xf32>
    %154 = vector.extract_strided_slice %38 {offsets = [8, 0], sizes = [8, 8], strides = [1, 1]} : vector<16x32xf32> to vector<8x8xf32>
    %155 = arith.truncf %154 : vector<8x8xf32> to vector<8x8xbf16>
    %156 = vector.extract_strided_slice %39 {offsets = [8, 0], sizes = [8, 8], strides = [1, 1]} : vector<16x32xf32> to vector<8x8xf32>
    %157 = arith.truncf %156 : vector<8x8xf32> to vector<8x8xbf16>
    %158 = vector.extract_strided_slice %40 {offsets = [8, 0], sizes = [8, 8], strides = [1, 1]} : vector<16x32xf32> to vector<8x8xf32>
    %159 = arith.truncf %158 : vector<8x8xf32> to vector<8x8xbf16>
    %cst_46 = arith.constant dense<0.000000e+00> : vector<8x8xf32>
    %160 = tpu.matmul %155, %157, %cst_46 {dimension_numbers = #tpu.dot_dimension_numbers<[1], [1], [0], [0], [0, 0, 1, 0], [], []>} : vector<8x8xbf16>, vector<8x8xbf16>, vector<8x8xf32> -> vector<8x8xf32>
    %161 = arith.addf %160, %46 : vector<8x8xf32>
    %cst_47 = arith.constant dense<0xFF800000> : vector<8xf32>
    %162 = vector.multi_reduction <maximumf>, %161, %cst_47 [1] : vector<8x8xf32> to vector<8xf32>
    %163 = vector.shape_cast %162 : vector<8xf32> to vector<8x1xf32>
    %164 = vector.broadcast %163 : vector<8x1xf32> to vector<8x8xf32>
    %165 = arith.subf %161, %164 : vector<8x8xf32>
    %166 = math.exp %165 : vector<8x8xf32>
    %cst_48 = arith.constant dense<0.000000e+00> : vector<8xf32>
    %167 = vector.multi_reduction <add>, %166, %cst_48 [1] : vector<8x8xf32> to vector<8xf32>
    %168 = vector.shape_cast %167 : vector<8xf32> to vector<8x1xf32>
    %169 = tpu.reciprocal %168 {approx = true} : vector<8x1xf32> -> vector<8x1xf32>
    %170 = vector.broadcast %169 : vector<8x1xf32> to vector<8x8xf32>
    %171 = arith.mulf %166, %170 : vector<8x8xf32>
    %172 = arith.truncf %171 : vector<8x8xf32> to vector<8x8xbf16>
    %cst_49 = arith.constant dense<0.000000e+00> : vector<8x8xf32>
    %173 = tpu.matmul %172, %159, %cst_49 {dimension_numbers = #tpu.dot_dimension_numbers<[1], [0], [0], [1], [0, 0, 1, 1], [], []>} : vector<8x8xbf16>, vector<8x8xbf16>, vector<8x8xf32> -> vector<8x8xf32>
    %174 = arith.truncf %173 : vector<8x8xf32> to vector<8x8xbf16>
    %c0_50 = arith.constant 0 : index
    %c0_51 = arith.constant 0 : index
    %175 = vector.load %arg6[%c0_50, %c0_51] : memref<32x32xbf16, #tpu.memory_space<vmem>>, vector<8x32xbf16>
    %cst_52 = arith.constant dense<0.000000e+00> : vector<8x32xf32>
    %176 = tpu.matmul %174, %175, %cst_52 {dimension_numbers = #tpu.dot_dimension_numbers<[1], [0], [0], [1], [0, 0, 1, 1], [], []>} : vector<8x8xbf16>, vector<8x32xbf16>, vector<8x32xf32> -> vector<8x32xf32>
    %177 = arith.addf %153, %176 : vector<8x32xf32>
    %178 = vector.extract_strided_slice %38 {offsets = [8, 8], sizes = [8, 8], strides = [1, 1]} : vector<16x32xf32> to vector<8x8xf32>
    %179 = arith.truncf %178 : vector<8x8xf32> to vector<8x8xbf16>
    %180 = vector.extract_strided_slice %39 {offsets = [8, 8], sizes = [8, 8], strides = [1, 1]} : vector<16x32xf32> to vector<8x8xf32>
    %181 = arith.truncf %180 : vector<8x8xf32> to vector<8x8xbf16>
    %182 = vector.extract_strided_slice %40 {offsets = [8, 8], sizes = [8, 8], strides = [1, 1]} : vector<16x32xf32> to vector<8x8xf32>
    %183 = arith.truncf %182 : vector<8x8xf32> to vector<8x8xbf16>
    %cst_53 = arith.constant dense<0.000000e+00> : vector<8x8xf32>
    %184 = tpu.matmul %179, %181, %cst_53 {dimension_numbers = #tpu.dot_dimension_numbers<[1], [1], [0], [0], [0, 0, 1, 0], [], []>} : vector<8x8xbf16>, vector<8x8xbf16>, vector<8x8xf32> -> vector<8x8xf32>
    %185 = arith.addf %184, %46 : vector<8x8xf32>
    %cst_54 = arith.constant dense<0xFF800000> : vector<8xf32>
    %186 = vector.multi_reduction <maximumf>, %185, %cst_54 [1] : vector<8x8xf32> to vector<8xf32>
    %187 = vector.shape_cast %186 : vector<8xf32> to vector<8x1xf32>
    %188 = vector.broadcast %187 : vector<8x1xf32> to vector<8x8xf32>
    %189 = arith.subf %185, %188 : vector<8x8xf32>
    %190 = math.exp %189 : vector<8x8xf32>
    %cst_55 = arith.constant dense<0.000000e+00> : vector<8xf32>
    %191 = vector.multi_reduction <add>, %190, %cst_55 [1] : vector<8x8xf32> to vector<8xf32>
    %192 = vector.shape_cast %191 : vector<8xf32> to vector<8x1xf32>
    %193 = tpu.reciprocal %192 {approx = true} : vector<8x1xf32> -> vector<8x1xf32>
    %194 = vector.broadcast %193 : vector<8x1xf32> to vector<8x8xf32>
    %195 = arith.mulf %190, %194 : vector<8x8xf32>
    %196 = arith.truncf %195 : vector<8x8xf32> to vector<8x8xbf16>
    %cst_56 = arith.constant dense<0.000000e+00> : vector<8x8xf32>
    %197 = tpu.matmul %196, %183, %cst_56 {dimension_numbers = #tpu.dot_dimension_numbers<[1], [0], [0], [1], [0, 0, 1, 1], [], []>} : vector<8x8xbf16>, vector<8x8xbf16>, vector<8x8xf32> -> vector<8x8xf32>
    %198 = arith.truncf %197 : vector<8x8xf32> to vector<8x8xbf16>
    %c8_57 = arith.constant 8 : index
    %c0_58 = arith.constant 0 : index
    %199 = vector.load %arg6[%c8_57, %c0_58] : memref<32x32xbf16, #tpu.memory_space<vmem>>, vector<8x32xbf16>
    %cst_59 = arith.constant dense<0.000000e+00> : vector<8x32xf32>
    %200 = tpu.matmul %198, %199, %cst_59 {dimension_numbers = #tpu.dot_dimension_numbers<[1], [0], [0], [1], [0, 0, 1, 1], [], []>} : vector<8x8xbf16>, vector<8x32xbf16>, vector<8x32xf32> -> vector<8x32xf32>
    %201 = arith.addf %177, %200 : vector<8x32xf32>
    %202 = vector.extract_strided_slice %38 {offsets = [8, 16], sizes = [8, 8], strides = [1, 1]} : vector<16x32xf32> to vector<8x8xf32>
    %203 = arith.truncf %202 : vector<8x8xf32> to vector<8x8xbf16>
    %204 = vector.extract_strided_slice %39 {offsets = [8, 16], sizes = [8, 8], strides = [1, 1]} : vector<16x32xf32> to vector<8x8xf32>
    %205 = arith.truncf %204 : vector<8x8xf32> to vector<8x8xbf16>
    %206 = vector.extract_strided_slice %40 {offsets = [8, 16], sizes = [8, 8], strides = [1, 1]} : vector<16x32xf32> to vector<8x8xf32>
    %207 = arith.truncf %206 : vector<8x8xf32> to vector<8x8xbf16>
    %cst_60 = arith.constant dense<0.000000e+00> : vector<8x8xf32>
    %208 = tpu.matmul %203, %205, %cst_60 {dimension_numbers = #tpu.dot_dimension_numbers<[1], [1], [0], [0], [0, 0, 1, 0], [], []>} : vector<8x8xbf16>, vector<8x8xbf16>, vector<8x8xf32> -> vector<8x8xf32>
    %209 = arith.addf %208, %46 : vector<8x8xf32>
    %cst_61 = arith.constant dense<0xFF800000> : vector<8xf32>
    %210 = vector.multi_reduction <maximumf>, %209, %cst_61 [1] : vector<8x8xf32> to vector<8xf32>
    %211 = vector.shape_cast %210 : vector<8xf32> to vector<8x1xf32>
    %212 = vector.broadcast %211 : vector<8x1xf32> to vector<8x8xf32>
    %213 = arith.subf %209, %212 : vector<8x8xf32>
    %214 = math.exp %213 : vector<8x8xf32>
    %cst_62 = arith.constant dense<0.000000e+00> : vector<8xf32>
    %215 = vector.multi_reduction <add>, %214, %cst_62 [1] : vector<8x8xf32> to vector<8xf32>
    %216 = vector.shape_cast %215 : vector<8xf32> to vector<8x1xf32>
    %217 = tpu.reciprocal %216 {approx = true} : vector<8x1xf32> -> vector<8x1xf32>
    %218 = vector.broadcast %217 : vector<8x1xf32> to vector<8x8xf32>
    %219 = arith.mulf %214, %218 : vector<8x8xf32>
    %220 = arith.truncf %219 : vector<8x8xf32> to vector<8x8xbf16>
    %cst_63 = arith.constant dense<0.000000e+00> : vector<8x8xf32>
    %221 = tpu.matmul %220, %207, %cst_63 {dimension_numbers = #tpu.dot_dimension_numbers<[1], [0], [0], [1], [0, 0, 1, 1], [], []>} : vector<8x8xbf16>, vector<8x8xbf16>, vector<8x8xf32> -> vector<8x8xf32>
    %222 = arith.truncf %221 : vector<8x8xf32> to vector<8x8xbf16>
    %c16_64 = arith.constant 16 : index
    %c0_65 = arith.constant 0 : index
    %223 = vector.load %arg6[%c16_64, %c0_65] : memref<32x32xbf16, #tpu.memory_space<vmem>>, vector<8x32xbf16>
    %cst_66 = arith.constant dense<0.000000e+00> : vector<8x32xf32>
    %224 = tpu.matmul %222, %223, %cst_66 {dimension_numbers = #tpu.dot_dimension_numbers<[1], [0], [0], [1], [0, 0, 1, 1], [], []>} : vector<8x8xbf16>, vector<8x32xbf16>, vector<8x32xf32> -> vector<8x32xf32>
    %225 = arith.addf %201, %224 : vector<8x32xf32>
    %226 = vector.extract_strided_slice %38 {offsets = [8, 24], sizes = [8, 8], strides = [1, 1]} : vector<16x32xf32> to vector<8x8xf32>
    %227 = arith.truncf %226 : vector<8x8xf32> to vector<8x8xbf16>
    %228 = vector.extract_strided_slice %39 {offsets = [8, 24], sizes = [8, 8], strides = [1, 1]} : vector<16x32xf32> to vector<8x8xf32>
    %229 = arith.truncf %228 : vector<8x8xf32> to vector<8x8xbf16>
    %230 = vector.extract_strided_slice %40 {offsets = [8, 24], sizes = [8, 8], strides = [1, 1]} : vector<16x32xf32> to vector<8x8xf32>
    %231 = arith.truncf %230 : vector<8x8xf32> to vector<8x8xbf16>
    %cst_67 = arith.constant dense<0.000000e+00> : vector<8x8xf32>
    %232 = tpu.matmul %227, %229, %cst_67 {dimension_numbers = #tpu.dot_dimension_numbers<[1], [1], [0], [0], [0, 0, 1, 0], [], []>} : vector<8x8xbf16>, vector<8x8xbf16>, vector<8x8xf32> -> vector<8x8xf32>
    %233 = arith.addf %232, %46 : vector<8x8xf32>
    %cst_68 = arith.constant dense<0xFF800000> : vector<8xf32>
    %234 = vector.multi_reduction <maximumf>, %233, %cst_68 [1] : vector<8x8xf32> to vector<8xf32>
    %235 = vector.shape_cast %234 : vector<8xf32> to vector<8x1xf32>
    %236 = vector.broadcast %235 : vector<8x1xf32> to vector<8x8xf32>
    %237 = arith.subf %233, %236 : vector<8x8xf32>
    %238 = math.exp %237 : vector<8x8xf32>
    %cst_69 = arith.constant dense<0.000000e+00> : vector<8xf32>
    %239 = vector.multi_reduction <add>, %238, %cst_69 [1] : vector<8x8xf32> to vector<8xf32>
    %240 = vector.shape_cast %239 : vector<8xf32> to vector<8x1xf32>
    %241 = tpu.reciprocal %240 {approx = true} : vector<8x1xf32> -> vector<8x1xf32>
    %242 = vector.broadcast %241 : vector<8x1xf32> to vector<8x8xf32>
    %243 = arith.mulf %238, %242 : vector<8x8xf32>
    %244 = arith.truncf %243 : vector<8x8xf32> to vector<8x8xbf16>
    %cst_70 = arith.constant dense<0.000000e+00> : vector<8x8xf32>
    %245 = tpu.matmul %244, %231, %cst_70 {dimension_numbers = #tpu.dot_dimension_numbers<[1], [0], [0], [1], [0, 0, 1, 1], [], []>} : vector<8x8xbf16>, vector<8x8xbf16>, vector<8x8xf32> -> vector<8x8xf32>
    %246 = arith.truncf %245 : vector<8x8xf32> to vector<8x8xbf16>
    %c24_71 = arith.constant 24 : index
    %c0_72 = arith.constant 0 : index
    %247 = vector.load %arg6[%c24_71, %c0_72] : memref<32x32xbf16, #tpu.memory_space<vmem>>, vector<8x32xbf16>
    %cst_73 = arith.constant dense<0.000000e+00> : vector<8x32xf32>
    %248 = tpu.matmul %246, %247, %cst_73 {dimension_numbers = #tpu.dot_dimension_numbers<[1], [0], [0], [1], [0, 0, 1, 1], [], []>} : vector<8x8xbf16>, vector<8x32xbf16>, vector<8x32xf32> -> vector<8x32xf32>
    %249 = arith.addf %225, %248 : vector<8x32xf32>
    %c8_74 = arith.constant 8 : index
    %c0_75 = arith.constant 0 : index
    %250 = vector.load %arg15[%c8_74, %c0_75] : memref<16x32xf32, #tpu.memory_space<vmem>>, vector<8x32xf32>
    tpu.vector_store %arg15[%c8_74, %c0_75], %249 {strides = array<i32>} : memref<16x32xf32, #tpu.memory_space<vmem>>, vector<8x32xf32>,
    %c0_76 = arith.constant 0 : index
    %c0_77 = arith.constant 0 : index
    %251 = vector.load %arg15[%c0_76, %c0_77] : memref<16x32xf32, #tpu.memory_space<vmem>>, vector<16x32xf32>
    %c0_78 = arith.constant 0 : index
    %c0_79 = arith.constant 0 : index
    %252 = vector.load %arg8[%c0_78, %c0_79] : memref<1x32xf32, #tpu.memory_space<vmem>>, vector<1x32xf32>
    %253 = vector.shape_cast %252 : vector<1x32xf32> to vector<32xf32>
    %c0_80 = arith.constant 0 : index
    %c0_81 = arith.constant 0 : index
    %254 = vector.load %arg9[%c0_80, %c0_81] : memref<1x32xf32, #tpu.memory_space<vmem>>, vector<1x32xf32>
    %255 = vector.shape_cast %254 : vector<1x32xf32> to vector<32xf32>
    %cst_82 = arith.constant dense<0.000000e+00> : vector<16xf32>
    %256 = vector.multi_reduction <add>, %251, %cst_82 [1] : vector<16x32xf32> to vector<16xf32>
    %257 = vector.shape_cast %256 : vector<16xf32> to vector<16x1xf32>
    %cst_83 = arith.constant 3.200000e+01 : f32
    %258 = vector.broadcast %cst_83 : f32 to vector<16x1xf32>
    %259 = arith.divf %257, %258 : vector<16x1xf32>
    %260 = arith.mulf %251, %251 : vector<16x32xf32>
    %cst_84 = arith.constant dense<0.000000e+00> : vector<16xf32>
    %261 = vector.multi_reduction <add>, %260, %cst_84 [1] : vector<16x32xf32> to vector<16xf32>
    %262 = vector.shape_cast %261 : vector<16xf32> to vector<16x1xf32>
    %cst_85 = arith.constant 3.200000e+01 : f32
    %263 = vector.broadcast %cst_85 : f32 to vector<16x1xf32>
    %264 = arith.divf %262, %263 : vector<16x1xf32>
    %265 = arith.mulf %259, %259 : vector<16x1xf32>
    %266 = arith.subf %264, %265 : vector<16x1xf32>
    %267 = vector.broadcast %259 : vector<16x1xf32> to vector<16x32xf32>
    %268 = arith.subf %251, %267 : vector<16x32xf32>
    %cst_86 = arith.constant 9.99999974E-6 : f32
    %269 = vector.broadcast %cst_86 : f32 to vector<16x1xf32>
    %270 = arith.addf %266, %269 : vector<16x1xf32>
    %271 = math.rsqrt %270 : vector<16x1xf32>
    %272 = vector.broadcast %271 : vector<16x1xf32> to vector<16x32xf32>
    %273 = arith.mulf %268, %272 : vector<16x32xf32>
    %274 = vector.shape_cast %253 : vector<32xf32> to vector<1x32xf32>
    %275 = vector.broadcast %274 : vector<1x32xf32> to vector<16x32xf32>
    %276 = arith.mulf %273, %275 : vector<16x32xf32>
    %277 = vector.shape_cast %255 : vector<32xf32> to vector<1x32xf32>
    %278 = vector.broadcast %277 : vector<1x32xf32> to vector<16x32xf32>
    %279 = arith.addf %276, %278 : vector<16x32xf32>
    %280 = arith.truncf %279 : vector<16x32xf32> to vector<16x32xbf16>
    %c0_87 = arith.constant 0 : index
    %c0_88 = arith.constant 0 : index
    %281 = vector.load %arg10[%c0_87, %c0_88] : memref<32x128xbf16, #tpu.memory_space<vmem>>, vector<32x128xbf16>
    %cst_89 = arith.constant dense<0.000000e+00> : vector<16x128xf32>
    %282 = tpu.matmul %280, %281, %cst_89 {dimension_numbers = #tpu.dot_dimension_numbers<[1], [0], [0], [1], [0, 0, 1, 1], [], []>} : vector<16x32xbf16>, vector<32x128xbf16>, vector<16x128xf32> -> vector<16x128xf32>
    %c0_90 = arith.constant 0 : index
    %c0_91 = arith.constant 0 : index
    %283 = vector.load %arg11[%c0_90, %c0_91] : memref<1x128xf32, #tpu.memory_space<vmem>>, vector<1x128xf32>
    %284 = vector.shape_cast %283 : vector<1x128xf32> to vector<128xf32>
    %285 = vector.shape_cast %284 : vector<128xf32> to vector<1x128xf32>
    %286 = vector.broadcast %285 : vector<1x128xf32> to vector<16x128xf32>
    %287 = arith.addf %282, %286 : vector<16x128xf32>
    %cst_92 = arith.constant 1.702000e+00 : f32
    %288 = vector.broadcast %cst_92 : f32 to vector<16x128xf32>
    %289 = arith.mulf %288, %287 : vector<16x128xf32>
    %290 = arith.negf %289 : vector<16x128xf32>
    %291 = math.exp %290 : vector<16x128xf32>
    %cst_93 = arith.constant 1.000000e+00 : f32
    %292 = vector.broadcast %cst_93 : f32 to vector<16x128xf32>
    %293 = arith.addf %292, %291 : vector<16x128xf32>
    %294 = arith.divf %292, %293 : vector<16x128xf32>
    %295 = arith.mulf %287, %294 : vector<16x128xf32>
    %296 = arith.truncf %295 : vector<16x128xf32> to vector<16x128xbf16>
    %c0_94 = arith.constant 0 : index
    %c0_95 = arith.constant 0 : index
    %297 = vector.load %arg12[%c0_94, %c0_95] : memref<128x32xbf16, #tpu.memory_space<vmem>>, vector<128x32xbf16>
    %cst_96 = arith.constant dense<0.000000e+00> : vector<16x32xf32>
    %298 = tpu.matmul %296, %297, %cst_96 {dimension_numbers = #tpu.dot_dimension_numbers<[1], [0], [0], [1], [0, 0, 1, 1], [], []>} : vector<16x128xbf16>, vector<128x32xbf16>, vector<16x32xf32> -> vector<16x32xf32>
    %c0_97 = arith.constant 0 : index
    %c0_98 = arith.constant 0 : index
    %299 = vector.load %arg13[%c0_97, %c0_98] : memref<1x32xf32, #tpu.memory_space<vmem>>, vector<1x32xf32>
    %300 = vector.shape_cast %299 : vector<1x32xf32> to vector<32xf32>
    %301 = vector.shape_cast %300 : vector<32xf32> to vector<1x32xf32>
    %302 = vector.broadcast %301 : vector<1x32xf32> to vector<16x32xf32>
    %303 = arith.addf %298, %302 : vector<16x32xf32>
    %304 = arith.addf %303, %251 : vector<16x32xf32>
    %305 = vector.shape_cast %304 : vector<16x32xf32> to vector<2x8x32xf32>
    %c0_99 = arith.constant 0 : index
    %c0_100 = arith.constant 0 : index
    %c0_101 = arith.constant 0 : index
    %306 = vector.load %arg14[%c0_99, %c0_100, %c0_101] : memref<2x8x32xf32, #tpu.memory_space<vmem>>, vector<2x8x32xf32>
    tpu.vector_store %arg14[%c0_99, %c0_100, %c0_101], %305 {strides = array<i32>} : memref<2x8x32xf32, #tpu.memory_space<vmem>>, vector<2x8x32xf32>,
    return
  }
  func.func @transform_0(%arg0: i32) -> (i32, i32, i32) {
    %c0_i32 = arith.constant 0 : i32
    %c0_i32_0 = arith.constant 0 : i32
    %c0_i32_1 = arith.constant 0 : i32
    return %arg0, %c0_i32, %c0_i32_0 : i32, i32, i32
  }
  func.func @transform_1(%arg0: i32) -> (i32, i32) {
    %c0_i32 = arith.constant 0 : i32
    %c0_i32_0 = arith.constant 0 : i32
    %c0_i32_1 = arith.constant 0 : i32
    return %c0_i32, %c0_i32_0 : i32, i32
  }
  func.func @transform_2(%arg0: i32) -> (i32, i32) {
    %c0_i32 = arith.constant 0 : i32
    %c0_i32_0 = arith.constant 0 : i32
    %c0_i32_1 = arith.constant 0 : i32
    return %c0_i32, %c0_i32_0 : i32, i32
  }
  func.func @transform_3(%arg0: i32) -> (i32, i32) {
    %c0_i32 = arith.constant 0 : i32
    %c0_i32_0 = arith.constant 0 : i32
    %c0_i32_1 = arith.constant 0 : i32
    return %c0_i32, %c0_i32_0 : i32, i32
  }
  func.func @transform_4(%arg0: i32) -> (i32, i32) {
    %c0_i32 = arith.constant 0 : i32
    %c0_i32_0 = arith.constant 0 : i32
    %c0_i32_1 = arith.constant 0 : i32
    return %c0_i32, %c0_i32_0 : i32, i32
  }
  func.func @transform_5(%arg0: i32) -> (i32, i32) {
    %c0_i32 = arith.constant 0 : i32
    %c0_i32_0 = arith.constant 0 : i32
    %c0_i32_1 = arith.constant 0 : i32
    return %c0_i32, %c0_i32_0 : i32, i32
  }
  func.func @transform_6(%arg0: i32) -> (i32, i32) {
    %c0_i32 = arith.constant 0 : i32
    %c0_i32_0 = arith.constant 0 : i32
    %c0_i32_1 = arith.constant 0 : i32
    return %c0_i32, %c0_i32_0 : i32, i32
  }
  func.func @transform_7(%arg0: i32) -> (i32, i32) {
    %c0_i32 = arith.constant 0 : i32
    %c0_i32_0 = arith.constant 0 : i32
    %c0_i32_1 = arith.constant 0 : i32
    return %c0_i32, %c0_i32_0 : i32, i32
  }
  func.func @transform_8(%arg0: i32) -> (i32, i32) {
    %c0_i32 = arith.constant 0 : i32
    %c0_i32_0 = arith.constant 0 : i32
    %c0_i32_1 = arith.constant 0 : i32
    return %c0_i32, %c0_i32_0 : i32, i32
  }
  func.func @transform_9(%arg0: i32) -> (i32, i32) {
    %c0_i32 = arith.constant 0 : i32
    %c0_i32_0 = arith.constant 0 : i32
    %c0_i32_1 = arith.constant 0 : i32
    return %c0_i32, %c0_i32_0 : i32, i32
  }
  func.func @transform_10(%arg0: i32) -> (i32, i32) {
    %c0_i32 = arith.constant 0 : i32
    %c0_i32_0 = arith.constant 0 : i32
    %c0_i32_1 = arith.constant 0 : i32
    return %c0_i32, %c0_i32_0 : i32, i32
  }
  func.func @transform_11(%arg0: i32) -> (i32, i32) {
    %c0_i32 = arith.constant 0 : i32
    %c0_i32_0 = arith.constant 0 : i32
    %c0_i32_1 = arith.constant 0 : i32
    return %c0_i32, %c0_i32_0 : i32, i32
  }
  func.func @transform_12(%arg0: i32) -> (i32, i32) {
    %c0_i32 = arith.constant 0 : i32
    %c0_i32_0 = arith.constant 0 : i32
    %c0_i32_1 = arith.constant 0 : i32
    return %c0_i32, %c0_i32_0 : i32, i32
  }
  func.func @transform_13(%arg0: i32) -> (i32, i32, i32) {
    %c0_i32 = arith.constant 0 : i32
    %c0_i32_0 = arith.constant 0 : i32
    %c0_i32_1 = arith.constant 0 : i32
    return %arg0, %c0_i32, %c0_i32_0 : i32, i32, i32
  }
}

</mosaic_0001>

<bundles_post_ra>
// kernel: tpu_custom_call.1
= control target key start
LH: loop header
LB: loop body
LE: loop exit
PB: predicated region body
PF: predicated region fallthrough
CT: control target
= control target key end

     0   :  { %vm50_vm0 = vcmask 261120   ;;  %s2597_s0 = inlined_call_operand.vmem [shape: f32[2,8,32], index: 0, kind: input, shape index: {}]   ;;  %s2598_s1 = inlined_call_operand.vmem [shape: f32[1,32], index: 1, kind: input, shape index: {}]   ;;  %s2599_s2 = inlined_call_operand.vmem [shape: f32[1,32], index: 2, kind: input, shape index: {}]   ;;  %s2600_s3 = inlined_call_operand.vmem [shape: bf16[32,96], index: 3, kind: input, shape index: {}]   ;;  %s2601_s4 = inlined_call_operand.vmem [shape: f32[1,96], index: 4, kind: input, shape index: {}]   ;;  %s2602_s5 = inlined_call_operand.vmem [shape: bf16[32,32], index: 5, kind: input, shape index: {}]   ;;  %s2603_s6 = inlined_call_operand.vmem [shape: f32[1,32], index: 6, kind: input, shape index: {}]   ;;  %s2604_s7 = inlined_call_operand.vmem [shape: f32[1,32], index: 7, kind: input, shape index: {}]   ;;  %s2605_s8 = inlined_call_operand.vmem [shape: f32[1,32], index: 8, kind: input, shape index: {}]   ;;  %s2606_s9 = inlined_call_operand.vmem [shape: bf16[32,128], index: 9, kind: input, shape index: {}]   ;;  %s2607_s10 = inlined_call_operand.vmem [shape: f32[1,128], index: 10, kind: input, shape index: {}]   ;;  %s2608_s11 = inlined_call_operand.vmem [shape: bf16[128,32], index: 11, kind: input, shape index: {}]   ;;  %s2609_s12 = inlined_call_operand.vmem [shape: f32[1,32], index: 12, kind: input, shape index: {}]   ;;  %s2610_s13 = inlined_call_operand.hbm [shape: f32[2,8,32], index: 13, kind: output, shape index: {}]  }
   0x1   :  { %v2230_v0 = vld [vmem:[%s2597_s0] sm:$0xff]  ;;  %v2235_v1 = vld [vmem:[%s2597_s0 + $0x8] sm:$0xff] }
   0x2   :  { %v51_v2 = vsel %vm50_vm0, %v2230_v0, 0.0  ;;  %v60_v3 = vmul.f32 %v2230_v0, %v2230_v0  ;;  %v54_v4 = vsel %vm50_vm0, %v2235_v1, 0.0  ;;  %v61_v5 = vmul.f32 %v2235_v1, %v2235_v1 }
   0x3   :  { %52 = vadd.xlane.f32.xlu0 %v51_v2 }
   0x4   :  { %v62_v6 = vsel %vm50_vm0, %v60_v3, 0.0  ;;  %v65_v7 = vsel %vm50_vm0, %v61_v5, 0.0 }
   0x5   :  { %63 = vadd.xlane.f32.xlu1 %v62_v6 }
   0x7   :  { %55 = vadd.xlane.f32.xlu0 %v54_v4 }
   0x9   :  { %66 = vadd.xlane.f32.xlu1 %v65_v7 }
   0xa   :  { %18 = vsyncpa [#allocation4], 0  ;;  %v2057_v8 = vld [vmem:[%s2600_s3] sm:$0xff]   ;;  %v2141_v9 = vmov 0.0   ;;  %vm2142_vm1 = vmmov 0   ;;  %v2058_v10 = vld [vmem:[%s2600_s3 + $0x8] sm:$0xff]   ;;  %v166_v54 = vlaneseq }
   0xb   :  { %1835 = vmatprep.subr.bf16.mxu1 %v2141_v9  ;;  %1839 = vmatprep.mubr.msk.bf16.mxu1 %vm2142_vm1, %v2141_v9  ;;  %v1724_v28 = vld [vmem:[%s2598_s1] ss:$0 sm:$0xff]  ;;  %s2144_s19 = smov 88   ;;  %s2145_s20 = smov 80   ;;  %vm184_vm2 = vcmask 64512   ;;  %vm248_vm4 = vcmask 1043456  }
   0xc   :  { %1836 = vmatpush3.bf16.msra.mxu1 %v2057_v8  ;;  %1861 = vmatprep.subr.bf16.mxu0 %v2141_v9  ;;  %v1725_v33 = vld [vmem:[%s2599_s2] ss:$0 sm:$0xff]  ;;  %s2143_s2 = smov 120   ;;  %s2147_s21 = smov 96   ;;  %v167_v56 = vshrl.u32 %v166_v54, 7  ;;  %v169_v57 = vand.u32 127, %v166_v54 }
   0xd   :  { %1837 = vmatprep.subr.bf16.mxu1 %v2141_v9  ;;  %1863 = vmatprep.mubr.msk.bf16.mxu0 %vm2142_vm1, %v2141_v9  ;;  %v1726_v38 = vld [vmem:[%s2601_s4] ss:$0 sm:$0xff]  ;;  %s2146_s4 = smov 112   ;;  %s2148_s22 = smov 48  }
   0xe   :  { %vm170_vm3 = vcmp.gt.s32.totalorder %v169_v57, %v167_v56  ;;  %s2149_s23 = smov 104   ;;  %s2150_s24 = smov 72  }
   0xf   :  { %v2306_v61 = vsel %vm170_vm3, -inf, %v2141_v9  ;;  %s2151_s25 = smov 64   ;;  %s2152_s28 = smov 56  }
  0x10   :  { %1838 = vmatpush3.bf16.msra.mxu1 %v2058_v10  ;;  %s2153_s3 = smov 40  }
  0x11   :  { %1843 = vmatprep.subr.bf16.mxu1 %v2141_v9 }
  0x90   :  { %v53_v11 = vpop.xlane.xlu0 %52 }
  0x91   :  { %v58_v12 = vmul.f32 0.03125, %v53_v11 }
  0x92   :  { %v64_v13 = vpop.xlane.xlu1 %63 }
  0x93   :  { %v70_v14 = vmul.f32 %v58_v12, %v58_v12  ;;  %v68_v15 = vmul.f32 0.03125, %v64_v13  ;;  %v74_v25 = vsub.f32 %v2230_v0, %v58_v12 }
  0x94   :  { %v56_v16 = vpop.xlane.xlu0 %55 }
  0x95   :  { %v72_v17 = vsub.f32 %v68_v15, %v70_v14  ;;  %v59_v18 = vmul.f32 0.03125, %v56_v16 }
  0x96   :  { %v67_v19 = vpop.xlane.xlu1 %66 }
  0x97   :  { %v76_v20 = vadd.f32 1e-05, %v72_v17  ;;  %v71_v21 = vmul.f32 %v59_v18, %v59_v18  ;;  %v69_v22 = vmul.f32 0.03125, %v67_v19  ;;  %v75_v29 = vsub.f32 %v2235_v1, %v59_v18 }
  0x99   :  { %2069 = vrsqrt.f32 %v76_v20  ;;  %v73_v23 = vsub.f32 %v69_v22, %v71_v21 }
  0x9b   :  { %v77_v24 = vadd.f32 1e-05, %v73_v23 }
  0x9d   :  { %2071 = vrsqrt.f32 %v77_v24 }
  0xa3   :  { %v2070_v26 = vpop.eup %2069 }
  0xa4   :  { %v80_v27 = vmul.f32 %v2070_v26, %v74_v25 }
  0xa6   :  { %v88_v32 = vmul.f32 %v1724_v28, %v80_v27 }
  0xa7   :  { %v2072_v30 = vpop.eup %2071 }
  0xa8   :  { %v81_v31 = vmul.f32 %v2072_v30, %v75_v29  ;;  %v96_v35 = vadd.f32 %v1725_v33, %v88_v32 }
  0xaa   :  { %v89_v34 = vmul.f32 %v1724_v28, %v81_v31 }
  0xac   :  { %v97_v36 = vadd.f32 %v1725_v33, %v89_v34 }
  0xae   :  { %v98_v37 = vpack.c.bf16 %v97_v36, %v96_v35 }
  0xb0   :  { %1840 = vmatmul.mubr.msk.bf16.vlgmr.msra.gmra.mrb[0].mxu1 %vm50_vm0, %v98_v37 }
  0xb1   :  { %1845 = vmatprep.mubr.msk.bf16.mxu1 %vm2142_vm1, %v2141_v9 }
 0x183   :  { %v159_v39 = vpop.f32.mrb[0].mxu1 }
 0x184   :  { %v160_v40 = vadd.f32 %v1726_v38, %v159_v39  ;;  %v1841_v41 = vpop.f32.mrb[1].mxu1 }
 0x185   :  { %v162_v42 = vpop.f32.mrb[2].mxu1 }
 0x186   :  { %v2275_v43 = vpack.c.bf16 %v160_v40, %v160_v40  ;;  %v163_v44 = vadd.f32 %v1726_v38, %v162_v42  ;;  %v1842_v45 = vpop.f32.mrb[3].mxu1 }
 0x188   :  { %341 = vrot.lane.b32.xlu1 %v2275_v43, %s2143_s2  ;;  %343 = vrot.lane.b32.xlu0 %v2275_v43, %s2144_s19  ;;  %v2314_v11 = vpack.c.bf16 %v163_v44, %v163_v44 }
 0x18c   :  { %502 = vrot.lane.b32.xlu1 %v2275_v43, %s2145_s20 }
 0x190   :  { %500 = vrot.lane.b32.xlu1 %v2275_v43, %s2146_s4 }
 0x194   :  { %182 = vrot.lane.b32.xlu1 %v2275_v43, %s2147_s21 }
 0x1fa   :  { %v342_v46 = vpop.permute.xlu1 %341  ;;  %v344_v47 = vpop.permute.xlu0 %343 }
 0x1fb   :  { %v349_v48 = vsel %vm184_vm2, %v344_v47, 0 }
 0x1fc   :  { %1862 = vmatpush3.bf16.xpose.msra.mxu0 %v349_v48 }
 0x1fd   :  { %1879 = vmatprep.subr.bf16.mxu0 %v2141_v9 }
 0x1fe   :  { %v503_v49 = vpop.permute.xlu1 %502 }
 0x1ff   :  { %v508_v51 = vsel %vm184_vm2, %v503_v49, 0 }
 0x202   :  { %v501_v50 = vpop.permute.xlu1 %500 }
 0x203   :  { %1864 = vmatmul.mubr.msk.bf16.vlgmr.msra.gmra.mrb[0].mxu0 %vm184_vm2, %v342_v46 }
 0x204   :  { %1880 = vmatpush3.bf16.xpose.msra.mxu0 %v508_v51  ;;  %1881 = vmatprep.mubr.msk.bf16.mxu0 %vm2142_vm1, %v2141_v9 }
 0x205   :  { %1885 = vmatprep.subr.bf16.mxu0 %v2141_v9 }
 0x206   :  { %v183_v52 = vpop.permute.xlu1 %182 }
 0x207   :  { %v189_v53 = vsel %vm184_vm2, %v183_v52, 0 }
 0x208   :  { %1844 = vmatpush3.bf16.xpose.msra.mxu1 %v189_v53 }
 0x209   :  { %1849 = vmatprep.subr.bf16.mxu1 %v2141_v9 }
 0x20b   :  { %1882 = vmatmul.mubr.msk.bf16.vlgmr.msra.gmra.mrb[4].mxu0 %vm184_vm2, %v501_v50 }
 0x20c   :  { %1887 = vmatprep.mubr.msk.bf16.mxu0 %vm2142_vm1, %v2141_v9 }
 0x20f   :  { %1846 = vmatmul.mubr.msk.bf16.vlgmr.msra.gmra.mrb[4].mxu1 %vm184_vm2, %v2275_v43 }
 0x210   :  { %1851 = vmatprep.mubr.msk.bf16.mxu1 %vm2142_vm1, %v2141_v9 }
 0x2d6   :  { %v2303_v55 = vpop.f32.mrb[0].mxu0 }
 0x2d7   :  { %v1865_v58 = vpop.f32.mrb[1].mxu0  ;;  %v386_v54 = vadd.f32 %v2303_v55, %v2306_v61 }
 0x2d8   :  { %v388_v59 = vpop.f32.mrb[2].mxu0 }
 0x2d9   :  { %v1866_v60 = vpop.f32.mrb[3].mxu0  ;;  %v391_v58 = vsel %vm184_vm2, %v386_v54, -inf  ;;  %v293_v59 = vld [vmem:[%s2602_s5] sm:$0xf] }
 0x2da   :  { %v298_v60 = vsel %vm248_vm4, %v293_v59, 0 }
 0x2de   :  { %v544_v62 = vpop.f32.mrb[4].mxu0 }
 0x2df   :  { %v545_v63 = vadd.f32 %v544_v62, %v2306_v61  ;;  %v1883_v2 = vpop.f32.mrb[5].mxu0 }
 0x2e0   :  { %v547_v3 = vpop.f32.mrb[6].mxu0 }
 0x2e1   :  { %v1884_v4 = vpop.f32.mrb[7].mxu0  ;;  %v550_v5 = vsel %vm184_vm2, %v545_v63, -inf }
 0x2e2   :  { %551 = vmax.xlane.f32.xlu0 %v550_v5  ;;  %v225_v6 = vpop.f32.mrb[4].mxu1 }
 0x2e3   :  { %v1847_v7 = vpop.f32.mrb[5].mxu1  ;;  %v226_v19 = vadd.f32 %v225_v6, %v2306_v61 }
 0x2e4   :  { %v228_v8 = vpop.f32.mrb[6].mxu1 }
 0x2e5   :  { %v1848_v10 = vpop.f32.mrb[7].mxu1  ;;  %v231_v20 = vsel %vm184_vm2, %v226_v19, -inf }
 0x2f8   :  { %562 = vrot.lane.b32.xlu0 %v2275_v43, %s2148_s22 }
 0x2fc   :  { %659 = vrot.lane.b32.xlu0 %v2275_v43, %s2149_s23 }
 0x300   :  { %822 = vrot.lane.b32.xlu0 %v2314_v11, %s2147_s21 }
 0x36f   :  { %v552_v12 = vpop.xlane.xlu0 %551 }
 0x370   :  { %v553_v13 = vsub.f32 %v545_v63, %v552_v12 }
 0x372   :  { %v554_v14 = vmul.f32 1.442695, %v553_v13 }
 0x373   :  { %v563_v15 = vpop.permute.xlu0 %562 }
 0x374   :  { %2073 = vpow2.f32 %v554_v14  ;;  %v568_v16 = vsel %vm248_vm4, %v563_v15, 0 }
 0x375   :  { %1886 = vmatpush3.bf16.msra.mxu0 %v568_v16 }
 0x376   :  { %1897 = vmatprep.subr.bf16.mxu0 %v2141_v9 }
 0x377   :  { %v660_v26 = vpop.permute.xlu0 %659 }
 0x37b   :  { %v823_v28 = vpop.permute.xlu0 %822 }
 0x37c   :  { %v828_v29 = vsel %vm184_vm2, %v823_v28, 0 }
 0x37e   :  { %v2074_v17 = vpop.eup %2073 }
 0x37f   :  { %v556_v18 = vsel %vm184_vm2, %v2074_v17, 0.0 }
 0x380   :  { %557 = vadd.xlane.f32.xlu1 %v556_v18 }
 0x391   :  { %661 = vrot.lane.b32.xlu1 %v2275_v43, %s2150_s24 }
 0x3b5   :  { %232 = vmax.xlane.f32.xlu1 %v231_v20 }
 0x40d   :  { %v558_v21 = vpop.xlane.xlu1 %557 }
 0x40e   :  { %2075 = vrcp.f32 %v558_v21 }
 0x411   :  { %v662_v24 = vpop.permute.xlu1 %661 }
 0x412   :  { %v667_v27 = vsel %vm184_vm2, %v662_v24, 0 }
 0x418   :  { %v2076_v22 = vpop.eup %2075 }
 0x419   :  { %v560_v23 = vmul.f32 %v2076_v22, %v2074_v17 }
 0x41b   :  { %v561_v25 = vpack.c.bf16 %v560_v23, %v560_v23 }
 0x41d   :  { %1888 = vmatmul.mubr.msk.bf16.vlgmr.msra.gmra.mrb[8].mxu0 %vm184_vm2, %v561_v25 }
 0x41e   :  { %1898 = vmatpush3.bf16.xpose.msra.mxu0 %v667_v27  ;;  %1899 = vmatprep.mubr.msk.bf16.mxu0 %vm2142_vm1, %v2141_v9 }
 0x41f   :  { %1915 = vmatprep.subr.bf16.mxu0 %v2141_v9 }
 0x425   :  { %1900 = vmatmul.mubr.msk.bf16.vlgmr.msra.gmra.mrb[12].mxu0 %vm184_vm2, %v660_v26 }
 0x426   :  { %1916 = vmatpush3.bf16.xpose.msra.mxu0 %v828_v29  ;;  %1917 = vmatprep.mubr.msk.bf16.mxu0 %vm2142_vm1, %v2141_v9 }
 0x427   :  { %1921 = vmatprep.subr.bf16.mxu0 %v2141_v9 }
 0x42d   :  { %1918 = vmatmul.mubr.msk.bf16.vlgmr.msra.gmra.mrb[16].mxu0 %vm184_vm2, %v2314_v11 }
 0x42e   :  { %1923 = vmatprep.mubr.msk.bf16.mxu0 %vm2142_vm1, %v2141_v9 }
 0x442   :  { %v233_v30 = vpop.xlane.xlu1 %232 }
 0x443   :  { %v234_v31 = vsub.f32 %v226_v19, %v233_v30 }
 0x445   :  { %v235_v32 = vmul.f32 1.442695, %v234_v31 }
 0x447   :  { %2077 = vpow2.f32 %v235_v32 }
 0x451   :  { %v2078_v33 = vpop.eup %2077 }
 0x452   :  { %v237_v34 = vsel %vm184_vm2, %v2078_v33, 0.0 }
 0x453   :  { %238 = vadd.xlane.f32.xlu0 %v237_v34 }
 0x469   :  { %243 = vrot.lane.b32.xlu0 %v2275_v43, %s2151_s25 }
 0x46d   :  { %981 = vrot.lane.b32.xlu0 %v2314_v11, %s2144_s19 }
 0x471   :  { %979 = vrot.lane.b32.xlu0 %v2314_v11, %s2143_s2 }
 0x475   :  { %1140 = vrot.lane.b32.xlu0 %v2314_v11, %s2145_s20 }
 0x4e0   :  { %v239_v35 = vpop.xlane.xlu0 %238 }
 0x4e1   :  { %2079 = vrcp.f32 %v239_v35 }
 0x4e4   :  { %v244_v36 = vpop.permute.xlu0 %243 }
 0x4e5   :  { %v250_v37 = vsel %vm248_vm4, %v244_v36, 0  ;;  %v452_v36 = vld [vmem:[%s2602_s5 + $0x4] sm:$0xf] }
 0x4e6   :  { %1850 = vmatpush3.bf16.msra.mxu1 %v250_v37  ;;  %v457_v37 = vsel %vm248_vm4, %v452_v36, 0  ;;  %v931_v36 = vld [vmem:[%s2602_s5] sm:$0xf] }
 0x4e7   :  { %1855 = vmatprep.subr.bf16.mxu1 %v2141_v9 }
 0x4e8   :  { %v982_v18 = vpop.permute.xlu0 %981 }
 0x4e9   :  { %v987_v32 = vsel %vm184_vm2, %v982_v18, 0 }
 0x4eb   :  { %v2080_v38 = vpop.eup %2079 }
 0x4ec   :  { %v241_v39 = vmul.f32 %v2080_v38, %v2078_v33  ;;  %v980_v19 = vpop.permute.xlu0 %979 }
 0x4ee   :  { %v242_v40 = vpack.c.bf16 %v241_v39, %v241_v39 }
 0x4f0   :  { %1852 = vmatmul.mubr.msk.bf16.vlgmr.msra.gmra.mrb[8].mxu1 %vm184_vm2, %v242_v40  ;;  %v2351_v41 = vpop.f32.mrb[8].mxu0  ;;  %v1141_v20 = vpop.permute.xlu0 %1140 }
 0x4f1   :  { %v1889_v42 = vpop.f32.mrb[9].mxu0  ;;  %1857 = vmatprep.mubr.msk.bf16.mxu1 %vm2142_vm1, %v2141_v9  ;;  %1856 = vmatpush3.bf16.msra.mxu1 %v298_v60  ;;  %v1146_v35 = vsel %vm184_vm2, %v1141_v20, 0  ;;  %v610_v60 = vpack.c.bf16 %v2351_v41, %v2351_v41 }
 0x4f2   :  { %v607_v44 = vpop.f32.mrb[10].mxu0  ;;  %1867 = vmatprep.subr.bf16.mxu1 %v2141_v9 }
 0x4f3   :  { %v1890_v45 = vpop.f32.mrb[11].mxu0 }
 0x4f4   :  { %v611_v45 = vld [vmem:[%s2602_s5 + $0x8] sm:$0xf] }
 0x4f8   :  { %v703_v46 = vpop.f32.mrb[12].mxu0 }
 0x4f9   :  { %v1901_v47 = vpop.f32.mrb[13].mxu0  ;;  %v704_v16 = vadd.f32 %v703_v46, %v2306_v61 }
 0x4fa   :  { %v706_v48 = vpop.f32.mrb[14].mxu0 }
 0x4fb   :  { %v1902_v49 = vpop.f32.mrb[15].mxu0  ;;  %v709_v17 = vsel %vm184_vm2, %v704_v16, -inf }
 0x500   :  { %v864_v50 = vpop.f32.mrb[16].mxu0 }
 0x501   :  { %v865_v51 = vadd.f32 %v864_v50, %v2306_v61  ;;  %v1919_v52 = vpop.f32.mrb[17].mxu0  ;;  %v616_v50 = vsel %vm248_vm4, %v611_v45, 0 }
 0x502   :  { %v867_v53 = vpop.f32.mrb[18].mxu0 }
 0x503   :  { %v1920_v56 = vpop.f32.mrb[19].mxu0  ;;  %v870_v57 = vsel %vm184_vm2, %v865_v51, -inf }
 0x504   :  { %871 = vmax.xlane.f32.xlu1 %v870_v57 }
 0x508   :  { %392 = vmax.xlane.f32.xlu1 %v391_v58 }
 0x591   :  { %v872_v62 = vpop.xlane.xlu1 %871 }
 0x592   :  { %v873_v63 = vsub.f32 %v865_v51, %v872_v62 }
 0x594   :  { %v874_v2 = vmul.f32 1.442695, %v873_v63 }
 0x595   :  { %v393_v55 = vpop.xlane.xlu1 %392 }
 0x596   :  { %2081 = vpow2.f32 %v874_v2  ;;  %v394_v3 = vsub.f32 %v386_v54, %v393_v55 }
 0x598   :  { %v395_v4 = vmul.f32 1.442695, %v394_v3 }
 0x59a   :  { %2083 = vpow2.f32 %v395_v4 }
 0x5a0   :  { %v2082_v5 = vpop.eup %2081 }
 0x5a1   :  { %v876_v6 = vsel %vm184_vm2, %v2082_v5, 0.0 }
 0x5a2   :  { %877 = vadd.xlane.f32.xlu1 %v876_v6 }
 0x5a4   :  { %v2084_v7 = vpop.eup %2083 }
 0x5a5   :  { %v397_v8 = vsel %vm184_vm2, %v2084_v7, 0.0 }
 0x5a6   :  { %398 = vadd.xlane.f32.xlu0 %v397_v8 }
 0x5b3   :  { %882 = vrot.lane.b32.xlu1 %v2314_v11, %s2151_s25 }
 0x5b7   :  { %1138 = vrot.lane.b32.xlu1 %v2314_v11, %s2146_s4 }
 0x5bb   :  { %403 = vrot.lane.b32.xlu1 %v2275_v43, %s2152_s28 }
 0x5c3   :  { %v286_v10 = vpop.f32.mrb[8].mxu1 }
 0x5c4   :  { %v292_v12 = vpack.c.bf16 %v286_v10, %v286_v10  ;;  %v1853_v13 = vpop.f32.mrb[9].mxu1 }
 0x5c5   :  { %v289_v14 = vpop.f32.mrb[10].mxu1 }
 0x5c6   :  { %v1854_v15 = vpop.f32.mrb[11].mxu1  ;;  %1858 = vmatmul.mubr.msk.bf16.vlgmr.msra.gmra.mrb[12].mxu1 %vm184_vm2, %v292_v12 }
 0x5c7   :  { %1869 = vmatprep.mubr.msk.bf16.mxu1 %vm2142_vm1, %v2141_v9 }
 0x5df   :  { %710 = vmax.xlane.f32.xlu1 %v709_v17 }
 0x62f   :  { %v878_v21 = vpop.xlane.xlu1 %877 }
 0x630   :  { %2085 = vrcp.f32 %v878_v21 }
 0x633   :  { %v399_v22 = vpop.xlane.xlu0 %398  ;;  %v883_v23 = vpop.permute.xlu1 %882 }
 0x634   :  { %2087 = vrcp.f32 %v399_v22  ;;  %v888_v24 = vsel %vm248_vm4, %v883_v23, 0 }
 0x635   :  { %1922 = vmatpush3.bf16.msra.mxu0 %v888_v24 }
 0x636   :  { %1933 = vmatprep.subr.bf16.mxu0 %v2141_v9 }
 0x637   :  { %v1139_v25 = vpop.permute.xlu1 %1138 }
 0x63a   :  { %v2086_v26 = vpop.eup %2085 }
 0x63b   :  { %v880_v27 = vmul.f32 %v2086_v26, %v2082_v5  ;;  %v404_v28 = vpop.permute.xlu1 %403 }
 0x63c   :  { %v409_v29 = vsel %vm248_vm4, %v404_v28, 0 }
 0x63d   :  { %1868 = vmatpush3.bf16.msra.mxu1 %v409_v29  ;;  %v881_v30 = vpack.c.bf16 %v880_v27, %v880_v27 }
 0x63e   :  { %v2088_v31 = vpop.eup %2087  ;;  %1873 = vmatprep.subr.bf16.mxu1 %v2141_v9 }
 0x63f   :  { %v401_v33 = vmul.f32 %v2088_v31, %v2084_v7  ;;  %1924 = vmatmul.mubr.msk.bf16.vlgmr.msra.gmra.mrb[20].mxu0 %vm184_vm2, %v881_v30 }
 0x640   :  { %1934 = vmatpush3.bf16.xpose.msra.mxu0 %v987_v32  ;;  %1935 = vmatprep.mubr.msk.bf16.mxu0 %vm2142_vm1, %v2141_v9 }
 0x641   :  { %v402_v34 = vpack.c.bf16 %v401_v33, %v401_v33  ;;  %1951 = vmatprep.subr.bf16.mxu0 %v2141_v9 }
 0x643   :  { %1870 = vmatmul.mubr.msk.bf16.vlgmr.msra.gmra.mrb[16].mxu1 %vm184_vm2, %v402_v34 }
 0x644   :  { %1875 = vmatprep.mubr.msk.bf16.mxu1 %vm2142_vm1, %v2141_v9  ;;  %1874 = vmatpush3.bf16.msra.mxu1 %v457_v37 }
 0x645   :  { %1891 = vmatprep.subr.bf16.mxu1 %v2141_v9 }
 0x647   :  { %1936 = vmatmul.mubr.msk.bf16.vlgmr.msra.gmra.mrb[24].mxu0 %vm184_vm2, %v980_v19 }
 0x648   :  { %1952 = vmatpush3.bf16.xpose.msra.mxu0 %v1146_v35  ;;  %1953 = vmatprep.mubr.msk.bf16.mxu0 %vm2142_vm1, %v2141_v9 }
 0x649   :  { %1957 = vmatprep.subr.bf16.mxu0 %v2141_v9 }
 0x64f   :  { %1954 = vmatmul.mubr.msk.bf16.vlgmr.msra.gmra.mrb[28].mxu0 %vm184_vm2, %v1139_v25  ;;  %v770_v25 = vld [vmem:[%s2602_s5 + $0xc] sm:$0xf] }
 0x650   :  { %1959 = vmatprep.mubr.msk.bf16.mxu0 %vm2142_vm1, %v2141_v9  ;;  %v775_v26 = vsel %vm248_vm4, %v770_v25, 0 }
 0x66c   :  { %v711_v38 = vpop.xlane.xlu1 %710 }
 0x66d   :  { %v712_v42 = vsub.f32 %v704_v16, %v711_v38 }
 0x66f   :  { %v713_v51 = vmul.f32 1.442695, %v712_v42  ;;  %v936_v42 = vsel %vm248_vm4, %v931_v36, 0 }
 0x671   :  { %2089 = vpow2.f32 %v713_v51 }
 0x67b   :  { %v2090_v4 = vpop.eup %2089 }
 0x67c   :  { %v715_v5 = vsel %vm184_vm2, %v2090_v4, 0.0 }
 0x712   :  { %v2403_v39 = vpop.f32.mrb[20].mxu0 }
 0x713   :  { %v1925_v40 = vpop.f32.mrb[21].mxu0 }
 0x714   :  { %v927_v44 = vpop.f32.mrb[22].mxu0 }
 0x715   :  { %v1926_v46 = vpop.f32.mrb[23].mxu0 }
 0x716   :  { %v445_v47 = vpop.f32.mrb[16].mxu1 }
 0x717   :  { %v451_v48 = vpack.c.bf16 %v445_v47, %v445_v47  ;;  %v1871_v49 = vpop.f32.mrb[17].mxu1  ;;  %v930_v47 = vpack.c.bf16 %v2403_v39, %v2403_v39  ;;  %v1090_v39 = vld [vmem:[%s2602_s5 + $0x4] sm:$0xf] }
 0x718   :  { %v448_v52 = vpop.f32.mrb[18].mxu1 }
 0x719   :  { %v1872_v53 = vpop.f32.mrb[19].mxu1  ;;  %1876 = vmatmul.mubr.msk.bf16.vlgmr.msra.gmra.mrb[12].mxu1 %vm184_vm2, %v451_v48  ;;  %v1095_v52 = vsel %vm248_vm4, %v1090_v39, 0 }
 0x71a   :  { %v1023_v54 = vpop.f32.mrb[24].mxu0  ;;  %1892 = vmatpush3.bf16.msra.mxu1 %v616_v50  ;;  %1893 = vmatprep.mubr.msk.bf16.mxu1 %vm2142_vm1, %v2141_v9 }
 0x71b   :  { %v1937_v56 = vpop.f32.mrb[25].mxu0  ;;  %1903 = vmatprep.subr.bf16.mxu1 %v2141_v9  ;;  %v1024_v41 = vadd.f32 %v1023_v54, %v2306_v61 }
 0x71c   :  { %v1026_v57 = vpop.f32.mrb[26].mxu0 }
 0x71d   :  { %v1938_v58 = vpop.f32.mrb[27].mxu0  ;;  %v1029_v6 = vsel %vm184_vm2, %v1024_v41, -inf }
 0x722   :  { %v1182_v59 = vpop.f32.mrb[28].mxu0 }
 0x723   :  { %v1183_v62 = vadd.f32 %v1182_v59, %v2306_v61  ;;  %v1955_v63 = vpop.f32.mrb[29].mxu0 }
 0x724   :  { %v1185_v2 = vpop.f32.mrb[30].mxu0 }
 0x725   :  { %1894 = vmatmul.mubr.msk.bf16.vlgmr.msra.gmra.mrb[12].mxu1 %vm184_vm2, %v610_v60  ;;  %v1956_v55 = vpop.f32.mrb[31].mxu0  ;;  %v1188_v3 = vsel %vm184_vm2, %v1183_v62, -inf }
 0x726   :  { %1189 = vmax.xlane.f32.xlu0 %v1188_v3  ;;  %1905 = vmatprep.mubr.msk.bf16.mxu1 %vm2142_vm1, %v2141_v9  ;;  %v1730_v55 = vld [vmem:[%s2603_s6] ss:$0 sm:$0xff] }
 0x727   :  { %v179_v3 = vadd.f32 %v1730_v55, %v2230_v0  ;;  %v1249_v0 = vld [vmem:[%s2602_s5 + $0x8] sm:$0xf]  ;;  %v819_v36 = vadd.f32 %v1730_v55, %v2235_v1  ;;  %v2059_v1 = vld [vmem:[%s2606_s9] sm:$0xff]  }
 0x72a   :  { %716 = vadd.xlane.f32.xlu0 %v715_v5 }
 0x740   :  { %721 = vrot.lane.b32.xlu0 %v2275_v43, %s2153_s3 }
 0x744   :  { %1299 = vrot.lane.b32.xlu0 %v2314_v11, %s2150_s24 }
 0x763   :  { %1030 = vmax.xlane.f32.xlu0 %v1029_v6 }
 0x779   :  { %1041 = vrot.lane.b32.xlu0 %v2314_v11, %s2152_s28 }
 0x7b3   :  { %v1190_v7 = vpop.xlane.xlu0 %1189 }
 0x7b4   :  { %v1191_v8 = vsub.f32 %v1183_v62, %v1190_v7 }
 0x7b6   :  { %v1192_v10 = vmul.f32 1.442695, %v1191_v8 }
 0x7b7   :  { %v717_v12 = vpop.xlane.xlu0 %716 }
 0x7b8   :  { %2091 = vpow2.f32 %v1192_v10 }
 0x7b9   :  { %2093 = vrcp.f32 %v717_v12 }
 0x7bb   :  { %v722_v13 = vpop.permute.xlu0 %721 }
 0x7bc   :  { %v727_v43 = vsel %vm248_vm4, %v722_v13, 0 }
 0x7bd   :  { %1904 = vmatpush3.bf16.msra.mxu1 %v727_v43 }
 0x7be   :  { %1909 = vmatprep.subr.bf16.mxu1 %v2141_v9 }
 0x7bf   :  { %v1300_v19 = vpop.permute.xlu0 %1299 }
 0x7c0   :  { %v1305_v33 = vsel %vm184_vm2, %v1300_v19, 0 }
 0x7c2   :  { %v2092_v14 = vpop.eup %2091 }
 0x7c3   :  { %v2094_v15 = vpop.eup %2093  ;;  %v1194_v16 = vsel %vm184_vm2, %v2092_v14, 0.0 }
 0x7c4   :  { %v719_v17 = vmul.f32 %v2094_v15, %v2090_v4  ;;  %1195 = vadd.xlane.f32.xlu1 %v1194_v16  ;;  %v1254_v15 = vsel %vm248_vm4, %v1249_v0, 0 }
 0x7c6   :  { %v720_v18 = vpack.c.bf16 %v719_v17, %v719_v17 }
 0x7c8   :  { %1906 = vmatmul.mubr.msk.bf16.vlgmr.msra.gmra.mrb[20].mxu1 %vm184_vm2, %v720_v18 }
 0x7c9   :  { %1911 = vmatprep.mubr.msk.bf16.mxu1 %vm2142_vm1, %v2141_v9  ;;  %1910 = vmatpush3.bf16.msra.mxu1 %v775_v26 }
 0x7ca   :  { %1927 = vmatprep.subr.bf16.mxu1 %v2141_v9 }
 0x7d5   :  { %1200 = vrot.lane.b32.xlu1 %v2314_v11, %s2148_s22  ;;  %s2154_s22 = smov [#allocation3]  }
 0x7d9   :  { %1297 = vrot.lane.b32.xlu1 %v2314_v11, %s2149_s23 }
 0x7f0   :  { %v1031_v20 = vpop.xlane.xlu0 %1030 }
 0x7f1   :  { %v1032_v21 = vsub.f32 %v1024_v41, %v1031_v20 }
 0x7f3   :  { %v1033_v22 = vmul.f32 1.442695, %v1032_v21 }
 0x7f4   :  { %v1042_v46 = vpop.permute.xlu0 %1041 }
 0x7f5   :  { %2095 = vpow2.f32 %v1033_v22  ;;  %v1047_v49 = vsel %vm248_vm4, %v1042_v46, 0 }
 0x7ff   :  { %v2096_v23 = vpop.eup %2095 }
 0x800   :  { %v1035_v24 = vsel %vm184_vm2, %v2096_v23, 0.0 }
 0x801   :  { %1036 = vadd.xlane.f32.xlu1 %v1035_v24 }
 0x851   :  { %v1196_v27 = vpop.xlane.xlu1 %1195 }
 0x852   :  { %2097 = vrcp.f32 %v1196_v27 }
 0x855   :  { %v1201_v28 = vpop.permute.xlu1 %1200 }
 0x856   :  { %v1206_v29 = vsel %vm248_vm4, %v1201_v28, 0  ;;  %v1408_v28 = vld [vmem:[%s2602_s5 + $0xc] sm:$0xf]  ;;  %s1713_s5 = sshll.u32 %s2154_s22, 4  ;;  %s1714_s5 = int_to_ptr.vmem [resolvable:$true] %s1713_s5 }
 0x857   :  { %1958 = vmatpush3.bf16.msra.mxu0 %v1206_v29  ;;  %s2117_s23 = scalar_lea.vmem %s1714_s5, 256  ;;  %p2122_p1 = scmp.lt.s32.totalorder %s1714_s5, %s1714_s5 }
 0x858   :  { %1969 = vmatprep.subr.bf16.mxu0 %v2141_v9  ;;  %p2118_p0 = scmp.ne.s32.totalorder %s1714_s5, %s2117_s23  ;;  %p2123_p2 = scmp.lt.s32.totalorder %s2117_s23, %s2117_s23 }
 0x859   :  { %v1298_v34 = vpop.permute.xlu1 %1297 }
 0x85a   :  { %p2124_p3 = por %p2123_p2, %p2122_p1 }
 0x85c   :  { %v2098_v30 = vpop.eup %2097  ;;  %p2125_p4 = pnand %p2124_p3, %p2118_p0 }
 0x85d   :  { %v1198_v31 = vmul.f32 %v2098_v30, %v2092_v14 }
 0x85f   :  { %v1199_v32 = vpack.c.bf16 %v1198_v31, %v1198_v31  ;;  %v1413_v31 = vsel %vm248_vm4, %v1408_v28, 0 }
 0x861   :  { %1960 = vmatmul.mubr.msk.bf16.vlgmr.msra.gmra.mrb[32].mxu0 %vm184_vm2, %v1199_v32 }
 0x862   :  { %1970 = vmatpush3.bf16.xpose.msra.mxu0 %v1305_v33  ;;  %1971 = vmatprep.mubr.msk.bf16.mxu0 %vm2142_vm1, %v2141_v9 }
 0x863   :  { %1987 = vmatprep.subr.bf16.mxu0 %v2141_v9 }
 0x869   :  { %1972 = vmatmul.mubr.msk.bf16.vlgmr.msra.gmra.mrb[36].mxu0 %vm184_vm2, %v1298_v34 }
 0x86a   :  { %1991 = vmatprep.mubr.msk.bf16.mxu0 %vm2142_vm1, %v2141_v9  ;;  %1988 = vmatpush3.bf16.msra.mxu0 %v2059_v1 }
 0x86b   :  { %1989 = vmatprep.subr.bf16.mxu0 %v2141_v9 }
 0x88e   :  { %v1037_v35 = vpop.xlane.xlu1 %1036 }
 0x88f   :  { %2099 = vrcp.f32 %v1037_v35 }
 0x899   :  { %v2100_v48 = vpop.eup %2099 }
 0x89a   :  { %v1039_v50 = vmul.f32 %v2100_v48, %v2096_v23 }
 0x89b   :  { %v763_v37 = vpop.f32.mrb[20].mxu1 }
 0x89c   :  { %v769_v38 = vpack.c.bf16 %v763_v37, %v763_v37  ;;  %v1907_v40 = vpop.f32.mrb[21].mxu1  ;;  %v1040_v51 = vpack.c.bf16 %v1039_v50, %v1039_v50 }
 0x89d   :  { %v766_v44 = vpop.f32.mrb[22].mxu1 }
 0x89e   :  { %v1908_v45 = vpop.f32.mrb[23].mxu1  ;;  %1912 = vmatmul.mubr.msk.bf16.vlgmr.msra.gmra.mrb[12].mxu1 %vm184_vm2, %v769_v38 }
 0x89f   :  { %1928 = vmatpush3.bf16.msra.mxu1 %v936_v42  ;;  %1929 = vmatprep.mubr.msk.bf16.mxu1 %vm2142_vm1, %v2141_v9 }
 0x8a0   :  { %1939 = vmatprep.subr.bf16.mxu1 %v2141_v9 }
 0x8a6   :  { %1930 = vmatmul.mubr.msk.bf16.vlgmr.msra.gmra.mrb[24].mxu1 %vm184_vm2, %v930_v47 }
 0x8a7   :  { %1940 = vmatpush3.bf16.msra.mxu1 %v1047_v49  ;;  %1941 = vmatprep.mubr.msk.bf16.mxu1 %vm2142_vm1, %v2141_v9  ;;  %v2060_v49 = vld [vmem:[%s2606_s9 + $0x8] sm:$0xff]  }
 0x8a8   :  { %1945 = vmatprep.subr.bf16.mxu1 %v2141_v9  ;;  %1990 = vmatpush3.bf16.msra.mxu0 %v2060_v49 }
 0x8a9   :  { %1995 = vmatprep.subr.bf16.mxu0 %v2141_v9 }
 0x8ae   :  { %1942 = vmatmul.mubr.msk.bf16.vlgmr.msra.gmra.mrb[28].mxu1 %vm184_vm2, %v1040_v51 }
 0x8af   :  { %1947 = vmatprep.mubr.msk.bf16.mxu1 %vm2142_vm1, %v2141_v9  ;;  %1946 = vmatpush3.bf16.msra.mxu1 %v1095_v52 }
 0x8b0   :  { %1963 = vmatprep.subr.bf16.mxu1 %v2141_v9 }
 0x934   :  { %v1242_v53 = vpop.f32.mrb[32].mxu0 }
 0x935   :  { %v1961_v54 = vpop.f32.mrb[33].mxu0  ;;  %v1248_v18 = vpack.c.bf16 %v1242_v53, %v1242_v53 }
 0x936   :  { %v1245_v56 = vpop.f32.mrb[34].mxu0 }
 0x937   :  { %v1962_v57 = vpop.f32.mrb[35].mxu0 }
 0x93c   :  { %v1341_v58 = vpop.f32.mrb[36].mxu0 }
 0x93d   :  { %v1342_v59 = vadd.f32 %v1341_v58, %v2306_v61  ;;  %v1973_v60 = vpop.f32.mrb[37].mxu0 }
 0x93e   :  { %v1344_v62 = vpop.f32.mrb[38].mxu0 }
 0x93f   :  { %v1974_v63 = vpop.f32.mrb[39].mxu0  ;;  %v1347_v2 = vsel %vm184_vm2, %v1342_v59, -inf }
 0x940   :  { %1348 = vmax.xlane.f32.xlu1 %v1347_v2 }
 0x971   :  { %v811_v4 = vpop.f32.mrb[12].mxu1 }
 0x972   :  { %v2015_v5 = vadd.f32 %v811_v4, %v179_v3  ;;  %v1913_v41 = vpop.f32.mrb[13].mxu1 }
 0x973   :  { %v814_v6 = vpop.f32.mrb[14].mxu1 }
 0x974   :  { %818 = vst.msk [vmem:[#allocation2] sm:$0xff] %vm50_vm0, %v2015_v5  ;;  %v1914_v7 = vpop.f32.mrb[15].mxu1  ;;  %v1755_v5 = vld [vmem:[%s2604_s7] ss:$0 sm:$0xff] }
 0x97b   :  { %v2485_v61 = vld [vmem:[#allocation2] sm:$0xff] }
 0x97c   :  { %v1461_v8 = vsel %vm50_vm0, %v2485_v61, 0.0  ;;  %v1469_v10 = vmul.f32 %v2485_v61, %v2485_v61 }
 0x97d   :  { %1462 = vadd.xlane.f32.xlu0 %v1461_v8 }
 0x97e   :  { %v1471_v12 = vsel %vm50_vm0, %v1469_v10, 0.0  ;;  %v1756_v10 = vld [vmem:[%s2605_s8] ss:$0 sm:$0xff] }
 0x981   :  { %1472 = vadd.xlane.f32.xlu0 %v1471_v12  ;;  %v1083_v13 = vpop.f32.mrb[28].mxu1 }
 0x982   :  { %v1089_v43 = vpack.c.bf16 %v1083_v13, %v1083_v13  ;;  %v1943_v14 = vpop.f32.mrb[29].mxu1 }
 0x983   :  { %v1086_v16 = vpop.f32.mrb[30].mxu1  ;;  %v2061_v14 = vld [vmem:[%s2608_s11] sm:$0xff]  }
 0x984   :  { %v1944_v17 = vpop.f32.mrb[31].mxu1  ;;  %1948 = vmatmul.mubr.msk.bf16.vlgmr.msra.gmra.mrb[24].mxu1 %vm184_vm2, %v1089_v43  ;;  %v2063_v16 = vld [vmem:[%s2608_s11 + $0x10] sm:$0xff]  }
 0x985   :  { %1964 = vmatpush3.bf16.msra.mxu1 %v1254_v15  ;;  %1965 = vmatprep.mubr.msk.bf16.mxu1 %vm2142_vm1, %v2141_v9  ;;  %v2062_v15 = vld [vmem:[%s2608_s11 + $0x8] sm:$0xff]   ;;  %v2064_v17 = vld [vmem:[%s2608_s11 + $0x18] sm:$0xff]  }
 0x986   :  { %1975 = vmatprep.subr.bf16.mxu1 %v2141_v9 }
 0x990   :  { %1966 = vmatmul.mubr.msk.bf16.vlgmr.msra.gmra.mrb[24].mxu1 %vm184_vm2, %v1248_v18  ;;  %v2065_v18 = vld [vmem:[%s2608_s11 + $0x20] sm:$0xff]  }
 0x991   :  { %1977 = vmatprep.mubr.msk.bf16.mxu1 %vm2142_vm1, %v2141_v9 }
 0x9cd   :  { %v1349_v19 = vpop.xlane.xlu1 %1348 }
 0x9ce   :  { %v1350_v20 = vsub.f32 %v1342_v59, %v1349_v19  ;;  %v2066_v19 = vld [vmem:[%s2608_s11 + $0x28] sm:$0xff]  }
 0x9d0   :  { %v1351_v21 = vmul.f32 1.442695, %v1350_v20  ;;  %v2067_v20 = vld [vmem:[%s2608_s11 + $0x30] sm:$0xff]  }
 0x9d2   :  { %2101 = vpow2.f32 %v1351_v21  ;;  %v2068_v21 = vld [vmem:[%s2608_s11 + $0x38] sm:$0xff]  }
 0x9dc   :  { %v2102_v22 = vpop.eup %2101 }
 0x9dd   :  { %v1353_v23 = vsel %vm184_vm2, %v2102_v22, 0.0 }
 0x9de   :  { %1354 = vadd.xlane.f32.xlu1 %v1353_v23 }
 0x9ef   :  { %1359 = vrot.lane.b32.xlu1 %v2314_v11, %s2153_s3 }
 0xa0a   :  { %v1463_v50 = vpop.xlane.xlu0 %1462 }
 0xa0b   :  { %v1467_v39 = vmul.f32 0.03125, %v1463_v50 }
 0xa0d   :  { %v1479_v53 = vmul.f32 %v1467_v39, %v1467_v39  ;;  %v1483_v3 = vsub.f32 %v2485_v61, %v1467_v39 }
 0xa0e   :  { %v1473_v51 = vpop.xlane.xlu0 %1472 }
 0xa0f   :  { %v1477_v52 = vmul.f32 0.03125, %v1473_v51 }
 0xa11   :  { %v1481_v54 = vsub.f32 %v1477_v52, %v1479_v53 }
 0xa13   :  { %v1485_v56 = vadd.f32 1e-05, %v1481_v54 }
 0xa6b   :  { %v1355_v24 = vpop.xlane.xlu1 %1354 }
 0xa6c   :  { %2103 = vrcp.f32 %v1355_v24 }
 0xa6d   :  { %2105 = vrsqrt.f32 %v1485_v56 }
 0xa6f   :  { %v1360_v25 = vpop.permute.xlu1 %1359 }
 0xa70   :  { %v1365_v26 = vsel %vm248_vm4, %v1360_v25, 0 }
 0xa71   :  { %1976 = vmatpush3.bf16.msra.mxu1 %v1365_v26 }
 0xa72   :  { %1981 = vmatprep.subr.bf16.mxu1 %v2141_v9 }
 0xa76   :  { %v2104_v27 = vpop.eup %2103 }
 0xa77   :  { %v1357_v29 = vmul.f32 %v2104_v27, %v2102_v22  ;;  %v2106_v55 = vpop.eup %2105  ;;  %v1757_v22 = vld [vmem:[%s2607_s10] ss:$0 sm:$0xff] }
 0xa78   :  { %v1489_v4 = vmul.f32 %v2106_v55, %v1483_v3 }
 0xa79   :  { %v1358_v30 = vpack.c.bf16 %v1357_v29, %v1357_v29 }
 0xa7a   :  { %v1497_v8 = vmul.f32 %v1755_v5, %v1489_v4 }
 0xa7b   :  { %1978 = vmatmul.mubr.msk.bf16.vlgmr.msra.gmra.mrb[32].mxu1 %vm184_vm2, %v1358_v30 }
 0xa7c   :  { %1982 = vmatpush3.bf16.msra.mxu1 %v1413_v31  ;;  %1983 = vmatprep.mubr.msk.bf16.mxu1 %vm2142_vm1, %v2141_v9  ;;  %v1505_v12 = vadd.f32 %v1756_v10, %v1497_v8 }
 0xb4e   :  { %v1401_v11 = vpop.f32.mrb[32].mxu1 }
 0xb4f   :  { %v1407_v32 = vpack.c.bf16 %v1401_v11, %v1401_v11  ;;  %v1979_v33 = vpop.f32.mrb[33].mxu1 }
 0xb50   :  { %v1404_v34 = vpop.f32.mrb[34].mxu1 }
 0xb51   :  { %v1980_v35 = vpop.f32.mrb[35].mxu1  ;;  %1984 = vmatmul.mubr.msk.bf16.vlgmr.msra.gmra.mrb[24].mxu1 %vm184_vm2, %v1407_v32 }
 0xc24   :  { %v1449_v37 = vpop.f32.mrb[24].mxu1 }
 0xc25   :  { %v2016_v38 = vadd.f32 %v1449_v37, %v819_v36  ;;  %v1985_v40 = vpop.f32.mrb[25].mxu1 }
 0xc26   :  { %v1452_v42 = vpop.f32.mrb[26].mxu1 }
 0xc27   :  { %1456 = vst.msk [vmem:[#allocation2 + $0x8] sm:$0xff] %vm50_vm0, %v2016_v38  ;;  %v1986_v44 = vpop.f32.mrb[27].mxu1  ;;  %v1763_v42 = vld [vmem:[%s2609_s12] ss:$0 sm:$0xff] }
 0xc2e   :  { %v2518_v45 = vld [vmem:[#allocation2 + $0x8] sm:$0xff] }
 0xc2f   :  { %v1464_v46 = vsel %vm50_vm0, %v2518_v45, 0.0  ;;  %v1470_v47 = vmul.f32 %v2518_v45, %v2518_v45 }
 0xc30   :  { %1465 = vadd.xlane.f32.xlu1 %v1464_v46 }
 0xc31   :  { %v1474_v48 = vsel %vm50_vm0, %v1470_v47, 0.0 }
 0xc32   :  { %1475 = vadd.xlane.f32.xlu0 %v1474_v48 }
 0xcbd   :  { %v1466_v57 = vpop.xlane.xlu1 %1465 }
 0xcbe   :  { %v1468_v58 = vmul.f32 0.03125, %v1466_v57 }
 0xcbf   :  { %v1476_v59 = vpop.xlane.xlu0 %1475 }
 0xcc0   :  { %v1480_v60 = vmul.f32 %v1468_v58, %v1468_v58  ;;  %v1478_v62 = vmul.f32 0.03125, %v1476_v59  ;;  %v1484_v41 = vsub.f32 %v2518_v45, %v1468_v58 }
 0xcc2   :  { %v1482_v63 = vsub.f32 %v1478_v62, %v1480_v60 }
 0xcc4   :  { %v1486_v2 = vadd.f32 1e-05, %v1482_v63 }
 0xcc6   :  { %2107 = vrsqrt.f32 %v1486_v2 }
 0xcd0   :  { %v2108_v6 = vpop.eup %2107 }
 0xcd1   :  { %v1490_v7 = vmul.f32 %v2108_v6, %v1484_v41 }
 0xcd3   :  { %v1498_v0 = vmul.f32 %v1755_v5, %v1490_v7 }
 0xcd5   :  { %v1506_v13 = vadd.f32 %v1756_v10, %v1498_v0 }
 0xcd7   :  { %v1507_v43 = vpack.c.bf16 %v1506_v13, %v1505_v12 }
 0xcd9   :  { %1992 = vmatmul.mubr.msk.bf16.vlgmr.msra.gmra.mrb[40].mxu0 %vm50_vm0, %v1507_v43 }
 0xcda   :  { %2011 = vmatprep.mubr.msk.bf16.mxu0 %vm2142_vm1, %v2141_v9  ;;  %1996 = vmatpush3.bf16.msra.mxu0 %v2061_v14 }
 0xcdb   :  { %1997 = vmatprep.subr.bf16.mxu0 %v2141_v9 }
 0xcde   :  { %1998 = vmatpush3.bf16.msra.mxu0 %v2062_v15 }
 0xcdf   :  { %1999 = vmatprep.subr.bf16.mxu0 %v2141_v9 }
 0xce2   :  { %2000 = vmatpush3.bf16.msra.mxu0 %v2063_v16 }
 0xce3   :  { %2001 = vmatprep.subr.bf16.mxu0 %v2141_v9 }
 0xce6   :  { %2002 = vmatpush3.bf16.msra.mxu0 %v2064_v17 }
 0xce7   :  { %2003 = vmatprep.subr.bf16.mxu0 %v2141_v9 }
 0xcea   :  { %2004 = vmatpush3.bf16.msra.mxu0 %v2065_v18 }
 0xceb   :  { %2005 = vmatprep.subr.bf16.mxu0 %v2141_v9 }
 0xcee   :  { %2006 = vmatpush3.bf16.msra.mxu0 %v2066_v19 }
 0xcef   :  { %2007 = vmatprep.subr.bf16.mxu0 %v2141_v9 }
 0xcf2   :  { %2008 = vmatpush3.bf16.msra.mxu0 %v2067_v20 }
 0xcf3   :  { %2009 = vmatprep.subr.bf16.mxu0 %v2141_v9 }
 0xcf6   :  { %2010 = vmatpush3.bf16.msra.mxu0 %v2068_v21 }
 0xdac   :  { %v1568_v23 = vpop.f32.mrb[40].mxu0 }
 0xdad   :  { %v1569_v24 = vadd.f32 %v1757_v22, %v1568_v23  ;;  %v1993_v25 = vpop.f32.mrb[41].mxu0 }
 0xdae   :  { %v1571_v26 = vpop.f32.mrb[42].mxu0 }
 0xdaf   :  { %v1761_v27 = vmul.f32 -1.702, %v1569_v24  ;;  %v1572_v28 = vadd.f32 %v1757_v22, %v1571_v26  ;;  %v1994_v29 = vpop.f32.mrb[43].mxu0 }
 0xdb1   :  { %v1579_v30 = vmul.f32 1.442695, %v1761_v27  ;;  %v1762_v31 = vmul.f32 -1.702, %v1572_v28 }
 0xdb3   :  { %2109 = vpow2.f32 %v1579_v30  ;;  %v1581_v9 = vmul.f32 1.442695, %v1762_v31 }
 0xdb5   :  { %2111 = vpow2.f32 %v1581_v9 }
 0xdbd   :  { %v2110_v11 = vpop.eup %2109 }
 0xdbe   :  { %v1583_v32 = vadd.f32 1.0, %v2110_v11 }
 0xdbf   :  { %v2112_v33 = vpop.eup %2111 }
 0xdc0   :  { %2113 = vrcp.f32 %v1583_v32  ;;  %v1584_v34 = vadd.f32 1.0, %v2112_v33 }
 0xdc2   :  { %2115 = vrcp.f32 %v1584_v34 }
 0xdca   :  { %v2114_v35 = vpop.eup %2113 }
 0xdcb   :  { %v1589_v37 = vmul.f32 %v2114_v35, %v1569_v24 }
 0xdcc   :  { %v2116_v36 = vpop.eup %2115 }
 0xdcd   :  { %v1590_v38 = vmul.f32 %v2116_v36, %v1572_v28 }
 0xdcf   :  { %v1591_v40 = vpack.c.bf16 %v1590_v38, %v1589_v37 }
 0xdd1   :  { %2012 = vmatmul.mubr.bf16.vlgmr.msra.gmra.mrb[44].mxu0 %v1591_v40 }
 0xea4   :  { %v1697_v44 = vpop.f32.mrb[44].mxu0 }
 0xea5   :  { %v1698_v46 = vadd.f32 %v1763_v42, %v1697_v44  ;;  %v2013_v47 = vpop.f32.mrb[45].mxu0 }
 0xea6   :  { %v1700_v48 = vpop.f32.mrb[46].mxu0 }
 0xea7   :  { %v1704_v1 = vadd.f32 %v1698_v46, %v2485_v61  ;;  %v1701_v49 = vadd.f32 %v1763_v42, %v1700_v48  ;;  %v2014_v50 = vpop.f32.mrb[47].mxu0 }
 0xea9   :  { %1706 = vst.msk [vmem:[#allocation3] sm:$0xff] %vm50_vm0, %v1704_v1  ;;  %v1705_v51 = vadd.f32 %v1701_v49, %v2518_v45 }
 0xeab   :  { %1707 = vst.msk [vmem:[#allocation3 + $0x8] sm:$0xff] %vm50_vm0, %v1705_v51 }
 0xeac   :  { %2128 = shalt.err (!%p2125_p4)
}
 0xead   :  { %s2129_s25 = scalar_lea.hbm %s2610_s13, 256 }
 0xeae   :  { %p2130_p5 = scmp.ne.s32.totalorder %s2610_s13, %s2129_s25  ;;  %p2133_p6 = scmp.lt.u32.totalorder %s2129_s25, %s2610_s13 }
 0xeb0   :  { %p2135_p7 = pnand %p2133_p6, %p2130_p5 }
 0xeb2   :  { %2138 = shalt.err (!%p2135_p7)
}
 0xeb3   :  { %s2155_s0 = smov 128   ;;  %s2156_s7 = smov 8  }
 0xeb4   :  { %1719 = dma.vmem_to_hbm [thread:$0]  %s1714_s5, 256, %s2610_s13, [#allocation4], %s2155_s0, %s2155_s0, %s2156_s7  }
 0xeb5   :  { %2139 = dma.done.wait [#allocation4], 256  }
 0xeb6   :  { %2140 = vsyncadd [#allocation4], 4294967040 }
 0xeb7   :  { %1723 = vsyncpa [#allocation4], 1 }

</bundles_post_ra>
